<compile_context>
chip_gen: v7x
topology: tpu7x:2x2x1
jax: 0.10.0
libtpu: 0.0.40
codegen_flags: <defaults>
</compile_context>

<pallas_src>
import math
import jax
import jax.numpy as jnp
from jax.experimental import pallas as pl
from jax.experimental.pallas import tpu as pltpu

# ---- small config (analogue of ChronosBoltConfig, scaled down) ----
D_MODEL = 32
D_FF = 64
N_HEADS = 4
D_KV = 8
INNER = N_HEADS * D_KV            # 32
N_LAYERS = 2
NUM_BUCKETS = 8
MAX_DISTANCE = 16
EPS = 1e-6

B = 2
S = 8


def _rmsnorm(x, w):
    var = jnp.mean(x * x, axis=-1, keepdims=True)
    return x * jax.lax.rsqrt(var + EPS) * w


# ----------------------------------------------------------------------------
# Pallas kernel: single invocation (no grid).  All layers + final layer norm run
# inside the kernel; residual stream (B*S, D) and all weights stay in VMEM.
# ----------------------------------------------------------------------------
def encoder_kernel(h_ref, mask_ref, bias_ref,
                   wqkv_ref, wo_ref, ln1_ref, ln2_ref, wi_ref, wff_ref,
                   lnf_ref, out_ref):
    f32 = jnp.float32
    bf16 = jnp.bfloat16

    x = h_ref[...]                     # (B*S, D) residual stream, f32
    mask3 = mask_ref[...]              # (B, 1, S) additive key mask

    # Hoisted, layer-invariant additive term: mask + relative-position bias,
    # one (B, S, S) tensor per head, computed once and reused by every layer.
    mb = [mask3 + bias_ref[h] for h in range(N_HEADS)]

    for l in range(N_LAYERS):          # static unroll over layers
        # --- SelfAttention.layer_norm (T5 RMSNorm, f32) ---
        xn = _rmsnorm(x, ln1_ref[l])                               # (B*S, D)

        # --- fused QKV: ONE flat matmul on the folded batch (bf16 on MXU) ---
        qkv = jnp.dot(xn.astype(bf16), wqkv_ref[l],
                      preferred_element_type=f32)                  # (B*S, 3*INNER)

        # --- per-head attention (static unroll over H); batched over B ---
        ao = None
        for h in range(N_HEADS):
            q = qkv[:, h * D_KV:(h + 1) * D_KV].reshape(B, S, D_KV)
            k = qkv[:, INNER + h * D_KV:INNER + (h + 1) * D_KV].reshape(B, S, D_KV)
            v = qkv[:, 2 * INNER + h * D_KV:2 * INNER + (h + 1) * D_KV].reshape(B, S, D_KV)

            s = jnp.einsum("bqd,bkd->bqk", q, k,
                           preferred_element_type=f32)             # (B, S, S)
            s = s + mb[h]              # hoisted mask + bias (layer-invariant)

            # softmax (T5 style, no 1/sqrt(d) scale); f32, approx recip on EUP
            s = s - jnp.max(s, axis=-1, keepdims=True)
            p = jnp.exp(s)
            p = p * pl.reciprocal(jnp.sum(p, axis=-1, keepdims=True), approx=True)
            # attention dropout is identity in eval mode

            ctx = jnp.einsum("bqk,bkd->bqd", p, v,
                             preferred_element_type=f32)           # (B, S, D_KV)

            # partial output projection for this head (bf16 weights, f32 acc)
            part = jnp.dot(ctx.reshape(B * S, D_KV).astype(bf16), wo_ref[l, h],
                           preferred_element_type=f32)             # (B*S, D)
            ao = part if ao is None else ao + part

        x = x + ao                     # residual (dropout = id)

        # --- FeedForward ---
        xn2 = _rmsnorm(x, ln2_ref[l])
        ff = jnp.dot(xn2.astype(bf16), wi_ref[l], preferred_element_type=f32)
        ff = jnp.maximum(ff, 0.0)      # ReLU (dropout1 = id)
        ff = jnp.dot(ff.astype(bf16), wff_ref[l], preferred_element_type=f32)
        x = x + ff                     # residual (dropout2 = id)

    # --- Encoder.final_layer_norm (final dropout = id) ---
    out_ref[...] = _rmsnorm(x, lnf_ref[...])


# ----------------------------------------------------------------------------
# Plain-JAX glue: T5 relative-position bias (integer bucketing + gather).
# TODO(synk): integer bucket/gather stays in plain JAX (trace-time glue), not Pallas.
# ----------------------------------------------------------------------------
def compute_position_bias(rel_emb, q_len, k_len):
    qpos = jnp.arange(q_len, dtype=jnp.int32)[:, None]
    kpos = jnp.arange(k_len, dtype=jnp.int32)[None, :]
    rel = kpos - qpos                                          # (S, S)
    nb = NUM_BUCKETS // 2                                      # bidirectional
    buckets = jnp.where(rel > 0, nb, 0)
    rp = jnp.abs(rel)
    num_exact = nb // 2
    num_log = nb - num_exact
    log_ratio = (jnp.log(jnp.maximum(rp, 1).astype(jnp.float32) / num_exact)
                 / math.log(MAX_DISTANCE / num_exact))
    log_pos = num_exact + (log_ratio * num_log).astype(jnp.int32)
    log_pos = jnp.minimum(log_pos, nb - 1)
    buckets = buckets + jnp.where(rp < num_exact, rp, log_pos)
    values = rel_emb[buckets]                                  # (S, S, H)
    return jnp.transpose(values, (2, 0, 1))[None]              # (1, H, S, S)


# ----------------------------------------------------------------------------
# Wrapper: packs weights (trace-time constant transforms), folds the batch into
# rows outside the kernel, calls the kernel once for the whole Encoder.
# ----------------------------------------------------------------------------
def encoder_forward(params, hidden_states, mask):
    Bn, Sn, Dn = hidden_states.shape
    position_bias = compute_position_bias(params["rel_emb"], Sn, Sn)  # (1,H,S,S)
    bias_hss = position_bias[0]                                       # (H,S,S)
    mask_b1s = mask.reshape(Bn, 1, Sn).astype(jnp.float32)

    # Flat QKV packing: columns [Wq | Wk | Wv], each head-major within its block
    # (matches PyTorch's .view(b, -1, n_heads, d_kv) column ordering).
    wqkv = jnp.concatenate([params["wq"], params["wk"], params["wv"]],
                           axis=-1).astype(jnp.bfloat16)              # (L, D, 3*INNER)
    wo_h = params["wo"].reshape(N_LAYERS, N_HEADS, D_KV, Dn).astype(jnp.bfloat16)
    wi = params["wi"].astype(jnp.bfloat16)                            # (L, D, D_FF)
    wff = params["wff"].astype(jnp.bfloat16)                          # (L, D_FF, D)
    ln1 = params["ln1"].reshape(N_LAYERS, 1, Dn)
    ln2 = params["ln2"].reshape(N_LAYERS, 1, Dn)
    lnf = params["lnf"].reshape(1, Dn)

    # Fold batch into rows outside the kernel (free XLA reshape).
    h_flat = hidden_states.reshape(Bn * Sn, Dn)

    vmem = pl.BlockSpec(memory_space=pltpu.MemorySpace.VMEM)
    out = pl.pallas_call(
        encoder_kernel,
        out_shape=jax.ShapeDtypeStruct((Bn * Sn, Dn), jnp.float32),
        in_specs=[vmem] * 10,
        out_specs=vmem,
    )(h_flat, mask_b1s, bias_hss, wqkv, wo_h, ln1, ln2, wi, wff, lnf)
    return out.reshape(Bn, Sn, Dn)


# ----------------------------------------------------------------------------
# Pure-JAX reference (mirrors the PyTorch Encoder.forward) for a sanity check.
# ----------------------------------------------------------------------------
def reference_forward(params, h, mask):
    def rmsnorm(x, w):
        var = jnp.mean(x * x, axis=-1, keepdims=True)
        return w * (x * jax.lax.rsqrt(var + EPS))

    Bn, Sn, Dn = h.shape
    position_bias = compute_position_bias(params["rel_emb"], Sn, Sn)
    for l in range(N_LAYERS):
        xn = rmsnorm(h, params["ln1"][l])
        q = (xn @ params["wq"][l]).reshape(Bn, Sn, N_HEADS, D_KV).transpose(0, 2, 1, 3)
        k = (xn @ params["wk"][l]).reshape(Bn, Sn, N_HEADS, D_KV).transpose(0, 2, 1, 3)
        v = (xn @ params["wv"][l]).reshape(Bn, Sn, N_HEADS, D_KV).transpose(0, 2, 1, 3)
        scores = (jnp.einsum("bhqd,bhkd->bhqk", q, k)
                  + mask[:, None, None, :] + position_bias)
        p = jax.nn.softmax(scores, axis=-1)
        attn = (jnp.einsum("bhqk,bhkd->bhqd", p, v)
                .transpose(0, 2, 1, 3).reshape(Bn, Sn, INNER))
        h = h + attn @ params["wo"][l]
        hn = rmsnorm(h, params["ln2"][l])
        ff = jax.nn.relu(hn @ params["wi"][l]) @ params["wff"][l]
        h = h + ff
    return rmsnorm(h, params["lnf"])


if __name__ == "__main__":
    key = jax.random.PRNGKey(0)
    ks = jax.random.split(key, 12)

    # Deterministic synthetic parameters (PyTorch Linear weight (out,in) stored
    # pre-transposed as (in,out) for direct x @ W matmuls).
    params = {
        "ln1": 1.0 + 0.05 * jax.random.normal(ks[0], (N_LAYERS, D_MODEL), jnp.float32),
        "ln2": 1.0 + 0.05 * jax.random.normal(ks[1], (N_LAYERS, D_MODEL), jnp.float32),
        "lnf": 1.0 + 0.05 * jax.random.normal(ks[2], (D_MODEL,), jnp.float32),
        "wq": 0.05 * jax.random.normal(ks[3], (N_LAYERS, D_MODEL, INNER), jnp.float32),
        "wk": 0.05 * jax.random.normal(ks[4], (N_LAYERS, D_MODEL, INNER), jnp.float32),
        "wv": 0.05 * jax.random.normal(ks[5], (N_LAYERS, D_MODEL, INNER), jnp.float32),
        "wo": 0.05 * jax.random.normal(ks[6], (N_LAYERS, INNER, D_MODEL), jnp.float32),
        "wi": 0.05 * jax.random.normal(ks[7], (N_LAYERS, D_MODEL, D_FF), jnp.float32),
        "wff": 0.05 * jax.random.normal(ks[8], (N_LAYERS, D_FF, D_MODEL), jnp.float32),
        "rel_emb": 0.05 * jax.random.normal(ks[9], (NUM_BUCKETS, N_HEADS), jnp.float32),
    }

    hidden = jax.random.normal(ks[10], (B, S, D_MODEL), jnp.float32)
    # Extended additive mask (0 = attend, -1e9 = masked); mask last key of batch 1.
    mask = jnp.zeros((B, S), jnp.float32).at[1, -1].set(-1e9)

    out = jax.block_until_ready(encoder_forward(params, hidden, mask))
    ref = reference_forward(params, hidden, mask)

    assert out.shape == (B, S, D_MODEL)
    assert jnp.allclose(out, ref, atol=2e-2, rtol=2e-2), \
        float(jnp.max(jnp.abs(out - ref)))
    print("KERNEL_OK")
</pallas_src>

<mosaic_0001>
module attributes {stable_mosaic.version = 11 : i64} {
  func.func @encoder_kernel(%arg0: memref<16x32xf32, #tpu.memory_space<vmem>>, %arg1: memref<2x1x8xf32, #tpu.memory_space<vmem>>, %arg2: memref<4x8x8xf32, #tpu.memory_space<vmem>>, %arg3: memref<2x32x96xbf16, #tpu.memory_space<vmem>>, %arg4: memref<2x4x8x32xbf16, #tpu.memory_space<vmem>>, %arg5: memref<2x1x32xf32, #tpu.memory_space<vmem>>, %arg6: memref<2x1x32xf32, #tpu.memory_space<vmem>>, %arg7: memref<2x32x64xbf16, #tpu.memory_space<vmem>>, %arg8: memref<2x64x32xbf16, #tpu.memory_space<vmem>>, %arg9: memref<1x32xf32, #tpu.memory_space<vmem>>, %arg10: memref<16x32xf32, #tpu.memory_space<vmem>>) attributes {dimension_semantics = [], scalar_prefetch = 0 : i64, scratch_operands = 0 : i64, tpu.core_type = #tpu.core_type<tc>} {
    %c0 = arith.constant 0 : index
    %c0_0 = arith.constant 0 : index
    %0 = vector.load %arg0[%c0, %c0_0] : memref<16x32xf32, #tpu.memory_space<vmem>>, vector<16x32xf32>
    %c0_1 = arith.constant 0 : index
    %c0_2 = arith.constant 0 : index
    %c0_3 = arith.constant 0 : index
    %1 = vector.load %arg1[%c0_1, %c0_2, %c0_3] : memref<2x1x8xf32, #tpu.memory_space<vmem>>, vector<2x1x8xf32>
    %c0_4 = arith.constant 0 : index
    %c0_5 = arith.constant 0 : index
    %c0_6 = arith.constant 0 : index
    %2 = vector.load %arg2[%c0_4, %c0_5, %c0_6] : memref<4x8x8xf32, #tpu.memory_space<vmem>>, vector<1x8x8xf32>
    %3 = vector.shape_cast %2 : vector<1x8x8xf32> to vector<8x8xf32>
    %4 = vector.shape_cast %3 : vector<8x8xf32> to vector<1x8x8xf32>
    %5 = vector.broadcast %1 : vector<2x1x8xf32> to vector<2x8x8xf32>
    %6 = vector.broadcast %4 : vector<1x8x8xf32> to vector<2x8x8xf32>
    %7 = arith.addf %5, %6 : vector<2x8x8xf32>
    %c1 = arith.constant 1 : index
    %c0_7 = arith.constant 0 : index
    %c0_8 = arith.constant 0 : index
    %8 = vector.load %arg2[%c1, %c0_7, %c0_8] : memref<4x8x8xf32, #tpu.memory_space<vmem>>, vector<1x8x8xf32>
    %9 = vector.shape_cast %8 : vector<1x8x8xf32> to vector<8x8xf32>
    %10 = vector.shape_cast %9 : vector<8x8xf32> to vector<1x8x8xf32>
    %11 = vector.broadcast %1 : vector<2x1x8xf32> to vector<2x8x8xf32>
    %12 = vector.broadcast %10 : vector<1x8x8xf32> to vector<2x8x8xf32>
    %13 = arith.addf %11, %12 : vector<2x8x8xf32>
    %c2 = arith.constant 2 : index
    %c0_9 = arith.constant 0 : index
    %c0_10 = arith.constant 0 : index
    %14 = vector.load %arg2[%c2, %c0_9, %c0_10] : memref<4x8x8xf32, #tpu.memory_space<vmem>>, vector<1x8x8xf32>
    %15 = vector.shape_cast %14 : vector<1x8x8xf32> to vector<8x8xf32>
    %16 = vector.shape_cast %15 : vector<8x8xf32> to vector<1x8x8xf32>
    %17 = vector.broadcast %1 : vector<2x1x8xf32> to vector<2x8x8xf32>
    %18 = vector.broadcast %16 : vector<1x8x8xf32> to vector<2x8x8xf32>
    %19 = arith.addf %17, %18 : vector<2x8x8xf32>
    %c3 = arith.constant 3 : index
    %c0_11 = arith.constant 0 : index
    %c0_12 = arith.constant 0 : index
    %20 = vector.load %arg2[%c3, %c0_11, %c0_12] : memref<4x8x8xf32, #tpu.memory_space<vmem>>, vector<1x8x8xf32>
    %21 = vector.shape_cast %20 : vector<1x8x8xf32> to vector<8x8xf32>
    %22 = vector.shape_cast %21 : vector<8x8xf32> to vector<1x8x8xf32>
    %23 = vector.broadcast %1 : vector<2x1x8xf32> to vector<2x8x8xf32>
    %24 = vector.broadcast %22 : vector<1x8x8xf32> to vector<2x8x8xf32>
    %25 = arith.addf %23, %24 : vector<2x8x8xf32>
    %c0_13 = arith.constant 0 : index
    %c0_14 = arith.constant 0 : index
    %c0_15 = arith.constant 0 : index
    %26 = vector.load %arg5[%c0_13, %c0_14, %c0_15] : memref<2x1x32xf32, #tpu.memory_space<vmem>>, vector<1x1x32xf32>
    %27 = vector.shape_cast %26 : vector<1x1x32xf32> to vector<1x32xf32>
    %28 = arith.mulf %0, %0 : vector<16x32xf32>
    %cst = arith.constant dense<0.000000e+00> : vector<16xf32>
    %29 = vector.multi_reduction <add>, %28, %cst [1] : vector<16x32xf32> to vector<16xf32>
    %30 = vector.shape_cast %29 : vector<16xf32> to vector<16x1xf32>
    %cst_16 = arith.constant 3.200000e+01 : f32
    %31 = vector.broadcast %cst_16 : f32 to vector<16x1xf32>
    %32 = arith.divf %30, %31 : vector<16x1xf32>
    %cst_17 = arith.constant 9.99999997E-7 : f32
    %33 = vector.broadcast %cst_17 : f32 to vector<16x1xf32>
    %34 = arith.addf %32, %33 : vector<16x1xf32>
    %35 = math.rsqrt %34 : vector<16x1xf32>
    %36 = vector.broadcast %35 : vector<16x1xf32> to vector<16x32xf32>
    %37 = arith.mulf %0, %36 : vector<16x32xf32>
    %38 = vector.broadcast %27 : vector<1x32xf32> to vector<16x32xf32>
    %39 = arith.mulf %37, %38 : vector<16x32xf32>
    %40 = arith.truncf %39 : vector<16x32xf32> to vector<16x32xbf16>
    %c0_18 = arith.constant 0 : index
    %c0_19 = arith.constant 0 : index
    %c0_20 = arith.constant 0 : index
    %41 = vector.load %arg3[%c0_18, %c0_19, %c0_20] : memref<2x32x96xbf16, #tpu.memory_space<vmem>>, vector<1x32x96xbf16>
    %42 = vector.shape_cast %41 : vector<1x32x96xbf16> to vector<32x96xbf16>
    %cst_21 = arith.constant dense<0.000000e+00> : vector<16x96xf32>
    %43 = tpu.matmul %40, %42, %cst_21 {dimension_numbers = #tpu.dot_dimension_numbers<[1], [0], [0], [1], [0, 0, 1, 1], [], []>} : vector<16x32xbf16>, vector<32x96xbf16>, vector<16x96xf32> -> vector<16x96xf32>
    %44 = vector.extract_strided_slice %43 {offsets = [0, 0], sizes = [16, 8], strides = [1, 1]} : vector<16x96xf32> to vector<16x8xf32>
    %45 = vector.shape_cast %44 : vector<16x8xf32> to vector<2x8x8xf32>
    %46 = vector.extract_strided_slice %43 {offsets = [0, 32], sizes = [16, 8], strides = [1, 1]} : vector<16x96xf32> to vector<16x8xf32>
    %47 = vector.shape_cast %46 : vector<16x8xf32> to vector<2x8x8xf32>
    %48 = vector.extract_strided_slice %43 {offsets = [0, 64], sizes = [16, 8], strides = [1, 1]} : vector<16x96xf32> to vector<16x8xf32>
    %49 = vector.shape_cast %48 : vector<16x8xf32> to vector<2x8x8xf32>
    "tpu.trace_start"() <{level = 10 : i32, message = "bqd,bkd->bqk"}> : () -> ()
    %cst_22 = arith.constant dense<0.000000e+00> : vector<2x8x8xf32>
    %50 = tpu.matmul %45, %47, %cst_22 {dimension_numbers = #tpu.dot_dimension_numbers<[2], [2], [1], [1], [0, 0, 0, 1, 1, 1], [0], [0]>} : vector<2x8x8xf32>, vector<2x8x8xf32>, vector<2x8x8xf32> -> vector<2x8x8xf32>
    "tpu.trace_stop"() : () -> ()
    %51 = arith.addf %50, %7 : vector<2x8x8xf32>
    %cst_23 = arith.constant dense<0xFF800000> : vector<2x8xf32>
    %52 = vector.multi_reduction <maximumf>, %51, %cst_23 [2] : vector<2x8x8xf32> to vector<2x8xf32>
    %53 = vector.shape_cast %52 : vector<2x8xf32> to vector<2x8x1xf32>
    %54 = vector.broadcast %53 : vector<2x8x1xf32> to vector<2x8x8xf32>
    %55 = arith.subf %51, %54 : vector<2x8x8xf32>
    %56 = math.exp %55 : vector<2x8x8xf32>
    %cst_24 = arith.constant dense<0.000000e+00> : vector<2x8xf32>
    %57 = vector.multi_reduction <add>, %56, %cst_24 [2] : vector<2x8x8xf32> to vector<2x8xf32>
    %58 = vector.shape_cast %57 : vector<2x8xf32> to vector<2x8x1xf32>
    %59 = tpu.reciprocal %58 {approx = true} : vector<2x8x1xf32> -> vector<2x8x1xf32>
    %60 = vector.broadcast %59 : vector<2x8x1xf32> to vector<2x8x8xf32>
    %61 = arith.mulf %56, %60 : vector<2x8x8xf32>
    "tpu.trace_start"() <{level = 10 : i32, message = "bqk,bkd->bqd"}> : () -> ()
    %cst_25 = arith.constant dense<0.000000e+00> : vector<2x8x8xf32>
    %62 = tpu.matmul %61, %49, %cst_25 {dimension_numbers = #tpu.dot_dimension_numbers<[2], [1], [1], [2], [0, 0, 0, 1, 1, 2], [0], [0]>} : vector<2x8x8xf32>, vector<2x8x8xf32>, vector<2x8x8xf32> -> vector<2x8x8xf32>
    "tpu.trace_stop"() : () -> ()
    %63 = vector.shape_cast %62 : vector<2x8x8xf32> to vector<16x8xf32>
    %64 = arith.truncf %63 : vector<16x8xf32> to vector<16x8xbf16>
    %c0_26 = arith.constant 0 : index
    %c0_27 = arith.constant 0 : index
    %c0_28 = arith.constant 0 : index
    %c0_29 = arith.constant 0 : index
    %65 = vector.load %arg4[%c0_26, %c0_27, %c0_28, %c0_29] : memref<2x4x8x32xbf16, #tpu.memory_space<vmem>>, vector<1x1x8x32xbf16>
    %66 = vector.shape_cast %65 : vector<1x1x8x32xbf16> to vector<8x32xbf16>
    %cst_30 = arith.constant dense<0.000000e+00> : vector<16x32xf32>
    %67 = tpu.matmul %64, %66, %cst_30 {dimension_numbers = #tpu.dot_dimension_numbers<[1], [0], [0], [1], [0, 0, 1, 1], [], []>} : vector<16x8xbf16>, vector<8x32xbf16>, vector<16x32xf32> -> vector<16x32xf32>
    %68 = vector.extract_strided_slice %43 {offsets = [0, 8], sizes = [16, 8], strides = [1, 1]} : vector<16x96xf32> to vector<16x8xf32>
    %69 = vector.shape_cast %68 : vector<16x8xf32> to vector<2x8x8xf32>
    %70 = vector.extract_strided_slice %43 {offsets = [0, 40], sizes = [16, 8], strides = [1, 1]} : vector<16x96xf32> to vector<16x8xf32>
    %71 = vector.shape_cast %70 : vector<16x8xf32> to vector<2x8x8xf32>
    %72 = vector.extract_strided_slice %43 {offsets = [0, 72], sizes = [16, 8], strides = [1, 1]} : vector<16x96xf32> to vector<16x8xf32>
    %73 = vector.shape_cast %72 : vector<16x8xf32> to vector<2x8x8xf32>
    "tpu.trace_start"() <{level = 10 : i32, message = "bqd,bkd->bqk"}> : () -> ()
    %cst_31 = arith.constant dense<0.000000e+00> : vector<2x8x8xf32>
    %74 = tpu.matmul %69, %71, %cst_31 {dimension_numbers = #tpu.dot_dimension_numbers<[2], [2], [1], [1], [0, 0, 0, 1, 1, 1], [0], [0]>} : vector<2x8x8xf32>, vector<2x8x8xf32>, vector<2x8x8xf32> -> vector<2x8x8xf32>
    "tpu.trace_stop"() : () -> ()
    %75 = arith.addf %74, %13 : vector<2x8x8xf32>
    %cst_32 = arith.constant dense<0xFF800000> : vector<2x8xf32>
    %76 = vector.multi_reduction <maximumf>, %75, %cst_32 [2] : vector<2x8x8xf32> to vector<2x8xf32>
    %77 = vector.shape_cast %76 : vector<2x8xf32> to vector<2x8x1xf32>
    %78 = vector.broadcast %77 : vector<2x8x1xf32> to vector<2x8x8xf32>
    %79 = arith.subf %75, %78 : vector<2x8x8xf32>
    %80 = math.exp %79 : vector<2x8x8xf32>
    %cst_33 = arith.constant dense<0.000000e+00> : vector<2x8xf32>
    %81 = vector.multi_reduction <add>, %80, %cst_33 [2] : vector<2x8x8xf32> to vector<2x8xf32>
    %82 = vector.shape_cast %81 : vector<2x8xf32> to vector<2x8x1xf32>
    %83 = tpu.reciprocal %82 {approx = true} : vector<2x8x1xf32> -> vector<2x8x1xf32>
    %84 = vector.broadcast %83 : vector<2x8x1xf32> to vector<2x8x8xf32>
    %85 = arith.mulf %80, %84 : vector<2x8x8xf32>
    "tpu.trace_start"() <{level = 10 : i32, message = "bqk,bkd->bqd"}> : () -> ()
    %cst_34 = arith.constant dense<0.000000e+00> : vector<2x8x8xf32>
    %86 = tpu.matmul %85, %73, %cst_34 {dimension_numbers = #tpu.dot_dimension_numbers<[2], [1], [1], [2], [0, 0, 0, 1, 1, 2], [0], [0]>} : vector<2x8x8xf32>, vector<2x8x8xf32>, vector<2x8x8xf32> -> vector<2x8x8xf32>
    "tpu.trace_stop"() : () -> ()
    %87 = vector.shape_cast %86 : vector<2x8x8xf32> to vector<16x8xf32>
    %88 = arith.truncf %87 : vector<16x8xf32> to vector<16x8xbf16>
    %c0_35 = arith.constant 0 : index
    %c1_36 = arith.constant 1 : index
    %c0_37 = arith.constant 0 : index
    %c0_38 = arith.constant 0 : index
    %89 = vector.load %arg4[%c0_35, %c1_36, %c0_37, %c0_38] : memref<2x4x8x32xbf16, #tpu.memory_space<vmem>>, vector<1x1x8x32xbf16>
    %90 = vector.shape_cast %89 : vector<1x1x8x32xbf16> to vector<8x32xbf16>
    %cst_39 = arith.constant dense<0.000000e+00> : vector<16x32xf32>
    %91 = tpu.matmul %88, %90, %cst_39 {dimension_numbers = #tpu.dot_dimension_numbers<[1], [0], [0], [1], [0, 0, 1, 1], [], []>} : vector<16x8xbf16>, vector<8x32xbf16>, vector<16x32xf32> -> vector<16x32xf32>
    %92 = arith.addf %67, %91 : vector<16x32xf32>
    %93 = vector.extract_strided_slice %43 {offsets = [0, 16], sizes = [16, 8], strides = [1, 1]} : vector<16x96xf32> to vector<16x8xf32>
    %94 = vector.shape_cast %93 : vector<16x8xf32> to vector<2x8x8xf32>
    %95 = vector.extract_strided_slice %43 {offsets = [0, 48], sizes = [16, 8], strides = [1, 1]} : vector<16x96xf32> to vector<16x8xf32>
    %96 = vector.shape_cast %95 : vector<16x8xf32> to vector<2x8x8xf32>
    %97 = vector.extract_strided_slice %43 {offsets = [0, 80], sizes = [16, 8], strides = [1, 1]} : vector<16x96xf32> to vector<16x8xf32>
    %98 = vector.shape_cast %97 : vector<16x8xf32> to vector<2x8x8xf32>
    "tpu.trace_start"() <{level = 10 : i32, message = "bqd,bkd->bqk"}> : () -> ()
    %cst_40 = arith.constant dense<0.000000e+00> : vector<2x8x8xf32>
    %99 = tpu.matmul %94, %96, %cst_40 {dimension_numbers = #tpu.dot_dimension_numbers<[2], [2], [1], [1], [0, 0, 0, 1, 1, 1], [0], [0]>} : vector<2x8x8xf32>, vector<2x8x8xf32>, vector<2x8x8xf32> -> vector<2x8x8xf32>
    "tpu.trace_stop"() : () -> ()
    %100 = arith.addf %99, %19 : vector<2x8x8xf32>
    %cst_41 = arith.constant dense<0xFF800000> : vector<2x8xf32>
    %101 = vector.multi_reduction <maximumf>, %100, %cst_41 [2] : vector<2x8x8xf32> to vector<2x8xf32>
    %102 = vector.shape_cast %101 : vector<2x8xf32> to vector<2x8x1xf32>
    %103 = vector.broadcast %102 : vector<2x8x1xf32> to vector<2x8x8xf32>
    %104 = arith.subf %100, %103 : vector<2x8x8xf32>
    %105 = math.exp %104 : vector<2x8x8xf32>
    %cst_42 = arith.constant dense<0.000000e+00> : vector<2x8xf32>
    %106 = vector.multi_reduction <add>, %105, %cst_42 [2] : vector<2x8x8xf32> to vector<2x8xf32>
    %107 = vector.shape_cast %106 : vector<2x8xf32> to vector<2x8x1xf32>
    %108 = tpu.reciprocal %107 {approx = true} : vector<2x8x1xf32> -> vector<2x8x1xf32>
    %109 = vector.broadcast %108 : vector<2x8x1xf32> to vector<2x8x8xf32>
    %110 = arith.mulf %105, %109 : vector<2x8x8xf32>
    "tpu.trace_start"() <{level = 10 : i32, message = "bqk,bkd->bqd"}> : () -> ()
    %cst_43 = arith.constant dense<0.000000e+00> : vector<2x8x8xf32>
    %111 = tpu.matmul %110, %98, %cst_43 {dimension_numbers = #tpu.dot_dimension_numbers<[2], [1], [1], [2], [0, 0, 0, 1, 1, 2], [0], [0]>} : vector<2x8x8xf32>, vector<2x8x8xf32>, vector<2x8x8xf32> -> vector<2x8x8xf32>
    "tpu.trace_stop"() : () -> ()
    %112 = vector.shape_cast %111 : vector<2x8x8xf32> to vector<16x8xf32>
    %113 = arith.truncf %112 : vector<16x8xf32> to vector<16x8xbf16>
    %c0_44 = arith.constant 0 : index
    %c2_45 = arith.constant 2 : index
    %c0_46 = arith.constant 0 : index
    %c0_47 = arith.constant 0 : index
    %114 = vector.load %arg4[%c0_44, %c2_45, %c0_46, %c0_47] : memref<2x4x8x32xbf16, #tpu.memory_space<vmem>>, vector<1x1x8x32xbf16>
    %115 = vector.shape_cast %114 : vector<1x1x8x32xbf16> to vector<8x32xbf16>
    %cst_48 = arith.constant dense<0.000000e+00> : vector<16x32xf32>
    %116 = tpu.matmul %113, %115, %cst_48 {dimension_numbers = #tpu.dot_dimension_numbers<[1], [0], [0], [1], [0, 0, 1, 1], [], []>} : vector<16x8xbf16>, vector<8x32xbf16>, vector<16x32xf32> -> vector<16x32xf32>
    %117 = arith.addf %92, %116 : vector<16x32xf32>
    %118 = vector.extract_strided_slice %43 {offsets = [0, 24], sizes = [16, 8], strides = [1, 1]} : vector<16x96xf32> to vector<16x8xf32>
    %119 = vector.shape_cast %118 : vector<16x8xf32> to vector<2x8x8xf32>
    %120 = vector.extract_strided_slice %43 {offsets = [0, 56], sizes = [16, 8], strides = [1, 1]} : vector<16x96xf32> to vector<16x8xf32>
    %121 = vector.shape_cast %120 : vector<16x8xf32> to vector<2x8x8xf32>
    %122 = vector.extract_strided_slice %43 {offsets = [0, 88], sizes = [16, 8], strides = [1, 1]} : vector<16x96xf32> to vector<16x8xf32>
    %123 = vector.shape_cast %122 : vector<16x8xf32> to vector<2x8x8xf32>
    "tpu.trace_start"() <{level = 10 : i32, message = "bqd,bkd->bqk"}> : () -> ()
    %cst_49 = arith.constant dense<0.000000e+00> : vector<2x8x8xf32>
    %124 = tpu.matmul %119, %121, %cst_49 {dimension_numbers = #tpu.dot_dimension_numbers<[2], [2], [1], [1], [0, 0, 0, 1, 1, 1], [0], [0]>} : vector<2x8x8xf32>, vector<2x8x8xf32>, vector<2x8x8xf32> -> vector<2x8x8xf32>
    "tpu.trace_stop"() : () -> ()
    %125 = arith.addf %124, %25 : vector<2x8x8xf32>
    %cst_50 = arith.constant dense<0xFF800000> : vector<2x8xf32>
    %126 = vector.multi_reduction <maximumf>, %125, %cst_50 [2] : vector<2x8x8xf32> to vector<2x8xf32>
    %127 = vector.shape_cast %126 : vector<2x8xf32> to vector<2x8x1xf32>
    %128 = vector.broadcast %127 : vector<2x8x1xf32> to vector<2x8x8xf32>
    %129 = arith.subf %125, %128 : vector<2x8x8xf32>
    %130 = math.exp %129 : vector<2x8x8xf32>
    %cst_51 = arith.constant dense<0.000000e+00> : vector<2x8xf32>
    %131 = vector.multi_reduction <add>, %130, %cst_51 [2] : vector<2x8x8xf32> to vector<2x8xf32>
    %132 = vector.shape_cast %131 : vector<2x8xf32> to vector<2x8x1xf32>
    %133 = tpu.reciprocal %132 {approx = true} : vector<2x8x1xf32> -> vector<2x8x1xf32>
    %134 = vector.broadcast %133 : vector<2x8x1xf32> to vector<2x8x8xf32>
    %135 = arith.mulf %130, %134 : vector<2x8x8xf32>
    "tpu.trace_start"() <{level = 10 : i32, message = "bqk,bkd->bqd"}> : () -> ()
    %cst_52 = arith.constant dense<0.000000e+00> : vector<2x8x8xf32>
    %136 = tpu.matmul %135, %123, %cst_52 {dimension_numbers = #tpu.dot_dimension_numbers<[2], [1], [1], [2], [0, 0, 0, 1, 1, 2], [0], [0]>} : vector<2x8x8xf32>, vector<2x8x8xf32>, vector<2x8x8xf32> -> vector<2x8x8xf32>
    "tpu.trace_stop"() : () -> ()
    %137 = vector.shape_cast %136 : vector<2x8x8xf32> to vector<16x8xf32>
    %138 = arith.truncf %137 : vector<16x8xf32> to vector<16x8xbf16>
    %c0_53 = arith.constant 0 : index
    %c3_54 = arith.constant 3 : index
    %c0_55 = arith.constant 0 : index
    %c0_56 = arith.constant 0 : index
    %139 = vector.load %arg4[%c0_53, %c3_54, %c0_55, %c0_56] : memref<2x4x8x32xbf16, #tpu.memory_space<vmem>>, vector<1x1x8x32xbf16>
    %140 = vector.shape_cast %139 : vector<1x1x8x32xbf16> to vector<8x32xbf16>
    %cst_57 = arith.constant dense<0.000000e+00> : vector<16x32xf32>
    %141 = tpu.matmul %138, %140, %cst_57 {dimension_numbers = #tpu.dot_dimension_numbers<[1], [0], [0], [1], [0, 0, 1, 1], [], []>} : vector<16x8xbf16>, vector<8x32xbf16>, vector<16x32xf32> -> vector<16x32xf32>
    %142 = arith.addf %117, %141 : vector<16x32xf32>
    %143 = arith.addf %0, %142 : vector<16x32xf32>
    %c0_58 = arith.constant 0 : index
    %c0_59 = arith.constant 0 : index
    %c0_60 = arith.constant 0 : index
    %144 = vector.load %arg6[%c0_58, %c0_59, %c0_60] : memref<2x1x32xf32, #tpu.memory_space<vmem>>, vector<1x1x32xf32>
    %145 = vector.shape_cast %144 : vector<1x1x32xf32> to vector<1x32xf32>
    %146 = arith.mulf %143, %143 : vector<16x32xf32>
    %cst_61 = arith.constant dense<0.000000e+00> : vector<16xf32>
    %147 = vector.multi_reduction <add>, %146, %cst_61 [1] : vector<16x32xf32> to vector<16xf32>
    %148 = vector.shape_cast %147 : vector<16xf32> to vector<16x1xf32>
    %cst_62 = arith.constant 3.200000e+01 : f32
    %149 = vector.broadcast %cst_62 : f32 to vector<16x1xf32>
    %150 = arith.divf %148, %149 : vector<16x1xf32>
    %cst_63 = arith.constant 9.99999997E-7 : f32
    %151 = vector.broadcast %cst_63 : f32 to vector<16x1xf32>
    %152 = arith.addf %150, %151 : vector<16x1xf32>
    %153 = math.rsqrt %152 : vector<16x1xf32>
    %154 = vector.broadcast %153 : vector<16x1xf32> to vector<16x32xf32>
    %155 = arith.mulf %143, %154 : vector<16x32xf32>
    %156 = vector.broadcast %145 : vector<1x32xf32> to vector<16x32xf32>
    %157 = arith.mulf %155, %156 : vector<16x32xf32>
    %158 = arith.truncf %157 : vector<16x32xf32> to vector<16x32xbf16>
    %c0_64 = arith.constant 0 : index
    %c0_65 = arith.constant 0 : index
    %c0_66 = arith.constant 0 : index
    %159 = vector.load %arg7[%c0_64, %c0_65, %c0_66] : memref<2x32x64xbf16, #tpu.memory_space<vmem>>, vector<1x32x64xbf16>
    %160 = vector.shape_cast %159 : vector<1x32x64xbf16> to vector<32x64xbf16>
    %cst_67 = arith.constant dense<0.000000e+00> : vector<16x64xf32>
    %161 = tpu.matmul %158, %160, %cst_67 {dimension_numbers = #tpu.dot_dimension_numbers<[1], [0], [0], [1], [0, 0, 1, 1], [], []>} : vector<16x32xbf16>, vector<32x64xbf16>, vector<16x64xf32> -> vector<16x64xf32>
    %cst_68 = arith.constant 0.000000e+00 : f32
    %162 = vector.broadcast %cst_68 : f32 to vector<16x64xf32>
    %163 = arith.maximumf %161, %162 : vector<16x64xf32>
    %164 = arith.truncf %163 : vector<16x64xf32> to vector<16x64xbf16>
    %c0_69 = arith.constant 0 : index
    %c0_70 = arith.constant 0 : index
    %c0_71 = arith.constant 0 : index
    %165 = vector.load %arg8[%c0_69, %c0_70, %c0_71] : memref<2x64x32xbf16, #tpu.memory_space<vmem>>, vector<1x64x32xbf16>
    %166 = vector.shape_cast %165 : vector<1x64x32xbf16> to vector<64x32xbf16>
    %cst_72 = arith.constant dense<0.000000e+00> : vector<16x32xf32>
    %167 = tpu.matmul %164, %166, %cst_72 {dimension_numbers = #tpu.dot_dimension_numbers<[1], [0], [0], [1], [0, 0, 1, 1], [], []>} : vector<16x64xbf16>, vector<64x32xbf16>, vector<16x32xf32> -> vector<16x32xf32>
    %168 = arith.addf %143, %167 : vector<16x32xf32>
    %c1_73 = arith.constant 1 : index
    %c0_74 = arith.constant 0 : index
    %c0_75 = arith.constant 0 : index
    %169 = vector.load %arg5[%c1_73, %c0_74, %c0_75] : memref<2x1x32xf32, #tpu.memory_space<vmem>>, vector<1x1x32xf32>
    %170 = vector.shape_cast %169 : vector<1x1x32xf32> to vector<1x32xf32>
    %171 = arith.mulf %168, %168 : vector<16x32xf32>
    %cst_76 = arith.constant dense<0.000000e+00> : vector<16xf32>
    %172 = vector.multi_reduction <add>, %171, %cst_76 [1] : vector<16x32xf32> to vector<16xf32>
    %173 = vector.shape_cast %172 : vector<16xf32> to vector<16x1xf32>
    %cst_77 = arith.constant 3.200000e+01 : f32
    %174 = vector.broadcast %cst_77 : f32 to vector<16x1xf32>
    %175 = arith.divf %173, %174 : vector<16x1xf32>
    %cst_78 = arith.constant 9.99999997E-7 : f32
    %176 = vector.broadcast %cst_78 : f32 to vector<16x1xf32>
    %177 = arith.addf %175, %176 : vector<16x1xf32>
    %178 = math.rsqrt %177 : vector<16x1xf32>
    %179 = vector.broadcast %178 : vector<16x1xf32> to vector<16x32xf32>
    %180 = arith.mulf %168, %179 : vector<16x32xf32>
    %181 = vector.broadcast %170 : vector<1x32xf32> to vector<16x32xf32>
    %182 = arith.mulf %180, %181 : vector<16x32xf32>
    %183 = arith.truncf %182 : vector<16x32xf32> to vector<16x32xbf16>
    %c1_79 = arith.constant 1 : index
    %c0_80 = arith.constant 0 : index
    %c0_81 = arith.constant 0 : index
    %184 = vector.load %arg3[%c1_79, %c0_80, %c0_81] : memref<2x32x96xbf16, #tpu.memory_space<vmem>>, vector<1x32x96xbf16>
    %185 = vector.shape_cast %184 : vector<1x32x96xbf16> to vector<32x96xbf16>
    %cst_82 = arith.constant dense<0.000000e+00> : vector<16x96xf32>
    %186 = tpu.matmul %183, %185, %cst_82 {dimension_numbers = #tpu.dot_dimension_numbers<[1], [0], [0], [1], [0, 0, 1, 1], [], []>} : vector<16x32xbf16>, vector<32x96xbf16>, vector<16x96xf32> -> vector<16x96xf32>
    %187 = vector.extract_strided_slice %186 {offsets = [0, 0], sizes = [16, 8], strides = [1, 1]} : vector<16x96xf32> to vector<16x8xf32>
    %188 = vector.shape_cast %187 : vector<16x8xf32> to vector<2x8x8xf32>
    %189 = vector.extract_strided_slice %186 {offsets = [0, 32], sizes = [16, 8], strides = [1, 1]} : vector<16x96xf32> to vector<16x8xf32>
    %190 = vector.shape_cast %189 : vector<16x8xf32> to vector<2x8x8xf32>
    %191 = vector.extract_strided_slice %186 {offsets = [0, 64], sizes = [16, 8], strides = [1, 1]} : vector<16x96xf32> to vector<16x8xf32>
    %192 = vector.shape_cast %191 : vector<16x8xf32> to vector<2x8x8xf32>
    "tpu.trace_start"() <{level = 10 : i32, message = "bqd,bkd->bqk"}> : () -> ()
    %cst_83 = arith.constant dense<0.000000e+00> : vector<2x8x8xf32>
    %193 = tpu.matmul %188, %190, %cst_83 {dimension_numbers = #tpu.dot_dimension_numbers<[2], [2], [1], [1], [0, 0, 0, 1, 1, 1], [0], [0]>} : vector<2x8x8xf32>, vector<2x8x8xf32>, vector<2x8x8xf32> -> vector<2x8x8xf32>
    "tpu.trace_stop"() : () -> ()
    %194 = arith.addf %193, %7 : vector<2x8x8xf32>
    %cst_84 = arith.constant dense<0xFF800000> : vector<2x8xf32>
    %195 = vector.multi_reduction <maximumf>, %194, %cst_84 [2] : vector<2x8x8xf32> to vector<2x8xf32>
    %196 = vector.shape_cast %195 : vector<2x8xf32> to vector<2x8x1xf32>
    %197 = vector.broadcast %196 : vector<2x8x1xf32> to vector<2x8x8xf32>
    %198 = arith.subf %194, %197 : vector<2x8x8xf32>
    %199 = math.exp %198 : vector<2x8x8xf32>
    %cst_85 = arith.constant dense<0.000000e+00> : vector<2x8xf32>
    %200 = vector.multi_reduction <add>, %199, %cst_85 [2] : vector<2x8x8xf32> to vector<2x8xf32>
    %201 = vector.shape_cast %200 : vector<2x8xf32> to vector<2x8x1xf32>
    %202 = tpu.reciprocal %201 {approx = true} : vector<2x8x1xf32> -> vector<2x8x1xf32>
    %203 = vector.broadcast %202 : vector<2x8x1xf32> to vector<2x8x8xf32>
    %204 = arith.mulf %199, %203 : vector<2x8x8xf32>
    "tpu.trace_start"() <{level = 10 : i32, message = "bqk,bkd->bqd"}> : () -> ()
    %cst_86 = arith.constant dense<0.000000e+00> : vector<2x8x8xf32>
    %205 = tpu.matmul %204, %192, %cst_86 {dimension_numbers = #tpu.dot_dimension_numbers<[2], [1], [1], [2], [0, 0, 0, 1, 1, 2], [0], [0]>} : vector<2x8x8xf32>, vector<2x8x8xf32>, vector<2x8x8xf32> -> vector<2x8x8xf32>
    "tpu.trace_stop"() : () -> ()
    %206 = vector.shape_cast %205 : vector<2x8x8xf32> to vector<16x8xf32>
    %207 = arith.truncf %206 : vector<16x8xf32> to vector<16x8xbf16>
    %c1_87 = arith.constant 1 : index
    %c0_88 = arith.constant 0 : index
    %c0_89 = arith.constant 0 : index
    %c0_90 = arith.constant 0 : index
    %208 = vector.load %arg4[%c1_87, %c0_88, %c0_89, %c0_90] : memref<2x4x8x32xbf16, #tpu.memory_space<vmem>>, vector<1x1x8x32xbf16>
    %209 = vector.shape_cast %208 : vector<1x1x8x32xbf16> to vector<8x32xbf16>
    %cst_91 = arith.constant dense<0.000000e+00> : vector<16x32xf32>
    %210 = tpu.matmul %207, %209, %cst_91 {dimension_numbers = #tpu.dot_dimension_numbers<[1], [0], [0], [1], [0, 0, 1, 1], [], []>} : vector<16x8xbf16>, vector<8x32xbf16>, vector<16x32xf32> -> vector<16x32xf32>
    %211 = vector.extract_strided_slice %186 {offsets = [0, 8], sizes = [16, 8], strides = [1, 1]} : vector<16x96xf32> to vector<16x8xf32>
    %212 = vector.shape_cast %211 : vector<16x8xf32> to vector<2x8x8xf32>
    %213 = vector.extract_strided_slice %186 {offsets = [0, 40], sizes = [16, 8], strides = [1, 1]} : vector<16x96xf32> to vector<16x8xf32>
    %214 = vector.shape_cast %213 : vector<16x8xf32> to vector<2x8x8xf32>
    %215 = vector.extract_strided_slice %186 {offsets = [0, 72], sizes = [16, 8], strides = [1, 1]} : vector<16x96xf32> to vector<16x8xf32>
    %216 = vector.shape_cast %215 : vector<16x8xf32> to vector<2x8x8xf32>
    "tpu.trace_start"() <{level = 10 : i32, message = "bqd,bkd->bqk"}> : () -> ()
    %cst_92 = arith.constant dense<0.000000e+00> : vector<2x8x8xf32>
    %217 = tpu.matmul %212, %214, %cst_92 {dimension_numbers = #tpu.dot_dimension_numbers<[2], [2], [1], [1], [0, 0, 0, 1, 1, 1], [0], [0]>} : vector<2x8x8xf32>, vector<2x8x8xf32>, vector<2x8x8xf32> -> vector<2x8x8xf32>
    "tpu.trace_stop"() : () -> ()
    %218 = arith.addf %217, %13 : vector<2x8x8xf32>
    %cst_93 = arith.constant dense<0xFF800000> : vector<2x8xf32>
    %219 = vector.multi_reduction <maximumf>, %218, %cst_93 [2] : vector<2x8x8xf32> to vector<2x8xf32>
    %220 = vector.shape_cast %219 : vector<2x8xf32> to vector<2x8x1xf32>
    %221 = vector.broadcast %220 : vector<2x8x1xf32> to vector<2x8x8xf32>
    %222 = arith.subf %218, %221 : vector<2x8x8xf32>
    %223 = math.exp %222 : vector<2x8x8xf32>
    %cst_94 = arith.constant dense<0.000000e+00> : vector<2x8xf32>
    %224 = vector.multi_reduction <add>, %223, %cst_94 [2] : vector<2x8x8xf32> to vector<2x8xf32>
    %225 = vector.shape_cast %224 : vector<2x8xf32> to vector<2x8x1xf32>
    %226 = tpu.reciprocal %225 {approx = true} : vector<2x8x1xf32> -> vector<2x8x1xf32>
    %227 = vector.broadcast %226 : vector<2x8x1xf32> to vector<2x8x8xf32>
    %228 = arith.mulf %223, %227 : vector<2x8x8xf32>
    "tpu.trace_start"() <{level = 10 : i32, message = "bqk,bkd->bqd"}> : () -> ()
    %cst_95 = arith.constant dense<0.000000e+00> : vector<2x8x8xf32>
    %229 = tpu.matmul %228, %216, %cst_95 {dimension_numbers = #tpu.dot_dimension_numbers<[2], [1], [1], [2], [0, 0, 0, 1, 1, 2], [0], [0]>} : vector<2x8x8xf32>, vector<2x8x8xf32>, vector<2x8x8xf32> -> vector<2x8x8xf32>
    "tpu.trace_stop"() : () -> ()
    %230 = vector.shape_cast %229 : vector<2x8x8xf32> to vector<16x8xf32>
    %231 = arith.truncf %230 : vector<16x8xf32> to vector<16x8xbf16>
    %c1_96 = arith.constant 1 : index
    %c1_97 = arith.constant 1 : index
    %c0_98 = arith.constant 0 : index
    %c0_99 = arith.constant 0 : index
    %232 = vector.load %arg4[%c1_96, %c1_97, %c0_98, %c0_99] : memref<2x4x8x32xbf16, #tpu.memory_space<vmem>>, vector<1x1x8x32xbf16>
    %233 = vector.shape_cast %232 : vector<1x1x8x32xbf16> to vector<8x32xbf16>
    %cst_100 = arith.constant dense<0.000000e+00> : vector<16x32xf32>
    %234 = tpu.matmul %231, %233, %cst_100 {dimension_numbers = #tpu.dot_dimension_numbers<[1], [0], [0], [1], [0, 0, 1, 1], [], []>} : vector<16x8xbf16>, vector<8x32xbf16>, vector<16x32xf32> -> vector<16x32xf32>
    %235 = arith.addf %210, %234 : vector<16x32xf32>
    %236 = vector.extract_strided_slice %186 {offsets = [0, 16], sizes = [16, 8], strides = [1, 1]} : vector<16x96xf32> to vector<16x8xf32>
    %237 = vector.shape_cast %236 : vector<16x8xf32> to vector<2x8x8xf32>
    %238 = vector.extract_strided_slice %186 {offsets = [0, 48], sizes = [16, 8], strides = [1, 1]} : vector<16x96xf32> to vector<16x8xf32>
    %239 = vector.shape_cast %238 : vector<16x8xf32> to vector<2x8x8xf32>
    %240 = vector.extract_strided_slice %186 {offsets = [0, 80], sizes = [16, 8], strides = [1, 1]} : vector<16x96xf32> to vector<16x8xf32>
    %241 = vector.shape_cast %240 : vector<16x8xf32> to vector<2x8x8xf32>
    "tpu.trace_start"() <{level = 10 : i32, message = "bqd,bkd->bqk"}> : () -> ()
    %cst_101 = arith.constant dense<0.000000e+00> : vector<2x8x8xf32>
    %242 = tpu.matmul %237, %239, %cst_101 {dimension_numbers = #tpu.dot_dimension_numbers<[2], [2], [1], [1], [0, 0, 0, 1, 1, 1], [0], [0]>} : vector<2x8x8xf32>, vector<2x8x8xf32>, vector<2x8x8xf32> -> vector<2x8x8xf32>
    "tpu.trace_stop"() : () -> ()
    %243 = arith.addf %242, %19 : vector<2x8x8xf32>
    %cst_102 = arith.constant dense<0xFF800000> : vector<2x8xf32>
    %244 = vector.multi_reduction <maximumf>, %243, %cst_102 [2] : vector<2x8x8xf32> to vector<2x8xf32>
    %245 = vector.shape_cast %244 : vector<2x8xf32> to vector<2x8x1xf32>
    %246 = vector.broadcast %245 : vector<2x8x1xf32> to vector<2x8x8xf32>
    %247 = arith.subf %243, %246 : vector<2x8x8xf32>
    %248 = math.exp %247 : vector<2x8x8xf32>
    %cst_103 = arith.constant dense<0.000000e+00> : vector<2x8xf32>
    %249 = vector.multi_reduction <add>, %248, %cst_103 [2] : vector<2x8x8xf32> to vector<2x8xf32>
    %250 = vector.shape_cast %249 : vector<2x8xf32> to vector<2x8x1xf32>
    %251 = tpu.reciprocal %250 {approx = true} : vector<2x8x1xf32> -> vector<2x8x1xf32>
    %252 = vector.broadcast %251 : vector<2x8x1xf32> to vector<2x8x8xf32>
    %253 = arith.mulf %248, %252 : vector<2x8x8xf32>
    "tpu.trace_start"() <{level = 10 : i32, message = "bqk,bkd->bqd"}> : () -> ()
    %cst_104 = arith.constant dense<0.000000e+00> : vector<2x8x8xf32>
    %254 = tpu.matmul %253, %241, %cst_104 {dimension_numbers = #tpu.dot_dimension_numbers<[2], [1], [1], [2], [0, 0, 0, 1, 1, 2], [0], [0]>} : vector<2x8x8xf32>, vector<2x8x8xf32>, vector<2x8x8xf32> -> vector<2x8x8xf32>
    "tpu.trace_stop"() : () -> ()
    %255 = vector.shape_cast %254 : vector<2x8x8xf32> to vector<16x8xf32>
    %256 = arith.truncf %255 : vector<16x8xf32> to vector<16x8xbf16>
    %c1_105 = arith.constant 1 : index
    %c2_106 = arith.constant 2 : index
    %c0_107 = arith.constant 0 : index
    %c0_108 = arith.constant 0 : index
    %257 = vector.load %arg4[%c1_105, %c2_106, %c0_107, %c0_108] : memref<2x4x8x32xbf16, #tpu.memory_space<vmem>>, vector<1x1x8x32xbf16>
    %258 = vector.shape_cast %257 : vector<1x1x8x32xbf16> to vector<8x32xbf16>
    %cst_109 = arith.constant dense<0.000000e+00> : vector<16x32xf32>
    %259 = tpu.matmul %256, %258, %cst_109 {dimension_numbers = #tpu.dot_dimension_numbers<[1], [0], [0], [1], [0, 0, 1, 1], [], []>} : vector<16x8xbf16>, vector<8x32xbf16>, vector<16x32xf32> -> vector<16x32xf32>
    %260 = arith.addf %235, %259 : vector<16x32xf32>
    %261 = vector.extract_strided_slice %186 {offsets = [0, 24], sizes = [16, 8], strides = [1, 1]} : vector<16x96xf32> to vector<16x8xf32>
    %262 = vector.shape_cast %261 : vector<16x8xf32> to vector<2x8x8xf32>
    %263 = vector.extract_strided_slice %186 {offsets = [0, 56], sizes = [16, 8], strides = [1, 1]} : vector<16x96xf32> to vector<16x8xf32>
    %264 = vector.shape_cast %263 : vector<16x8xf32> to vector<2x8x8xf32>
    %265 = vector.extract_strided_slice %186 {offsets = [0, 88], sizes = [16, 8], strides = [1, 1]} : vector<16x96xf32> to vector<16x8xf32>
    %266 = vector.shape_cast %265 : vector<16x8xf32> to vector<2x8x8xf32>
    "tpu.trace_start"() <{level = 10 : i32, message = "bqd,bkd->bqk"}> : () -> ()
    %cst_110 = arith.constant dense<0.000000e+00> : vector<2x8x8xf32>
    %267 = tpu.matmul %262, %264, %cst_110 {dimension_numbers = #tpu.dot_dimension_numbers<[2], [2], [1], [1], [0, 0, 0, 1, 1, 1], [0], [0]>} : vector<2x8x8xf32>, vector<2x8x8xf32>, vector<2x8x8xf32> -> vector<2x8x8xf32>
    "tpu.trace_stop"() : () -> ()
    %268 = arith.addf %267, %25 : vector<2x8x8xf32>
    %cst_111 = arith.constant dense<0xFF800000> : vector<2x8xf32>
    %269 = vector.multi_reduction <maximumf>, %268, %cst_111 [2] : vector<2x8x8xf32> to vector<2x8xf32>
    %270 = vector.shape_cast %269 : vector<2x8xf32> to vector<2x8x1xf32>
    %271 = vector.broadcast %270 : vector<2x8x1xf32> to vector<2x8x8xf32>
    %272 = arith.subf %268, %271 : vector<2x8x8xf32>
    %273 = math.exp %272 : vector<2x8x8xf32>
    %cst_112 = arith.constant dense<0.000000e+00> : vector<2x8xf32>
    %274 = vector.multi_reduction <add>, %273, %cst_112 [2] : vector<2x8x8xf32> to vector<2x8xf32>
    %275 = vector.shape_cast %274 : vector<2x8xf32> to vector<2x8x1xf32>
    %276 = tpu.reciprocal %275 {approx = true} : vector<2x8x1xf32> -> vector<2x8x1xf32>
    %277 = vector.broadcast %276 : vector<2x8x1xf32> to vector<2x8x8xf32>
    %278 = arith.mulf %273, %277 : vector<2x8x8xf32>
    "tpu.trace_start"() <{level = 10 : i32, message = "bqk,bkd->bqd"}> : () -> ()
    %cst_113 = arith.constant dense<0.000000e+00> : vector<2x8x8xf32>
    %279 = tpu.matmul %278, %266, %cst_113 {dimension_numbers = #tpu.dot_dimension_numbers<[2], [1], [1], [2], [0, 0, 0, 1, 1, 2], [0], [0]>} : vector<2x8x8xf32>, vector<2x8x8xf32>, vector<2x8x8xf32> -> vector<2x8x8xf32>
    "tpu.trace_stop"() : () -> ()
    %280 = vector.shape_cast %279 : vector<2x8x8xf32> to vector<16x8xf32>
    %281 = arith.truncf %280 : vector<16x8xf32> to vector<16x8xbf16>
    %c1_114 = arith.constant 1 : index
    %c3_115 = arith.constant 3 : index
    %c0_116 = arith.constant 0 : index
    %c0_117 = arith.constant 0 : index
    %282 = vector.load %arg4[%c1_114, %c3_115, %c0_116, %c0_117] : memref<2x4x8x32xbf16, #tpu.memory_space<vmem>>, vector<1x1x8x32xbf16>
    %283 = vector.shape_cast %282 : vector<1x1x8x32xbf16> to vector<8x32xbf16>
    %cst_118 = arith.constant dense<0.000000e+00> : vector<16x32xf32>
    %284 = tpu.matmul %281, %283, %cst_118 {dimension_numbers = #tpu.dot_dimension_numbers<[1], [0], [0], [1], [0, 0, 1, 1], [], []>} : vector<16x8xbf16>, vector<8x32xbf16>, vector<16x32xf32> -> vector<16x32xf32>
    %285 = arith.addf %260, %284 : vector<16x32xf32>
    %286 = arith.addf %168, %285 : vector<16x32xf32>
    %c1_119 = arith.constant 1 : index
    %c0_120 = arith.constant 0 : index
    %c0_121 = arith.constant 0 : index
    %287 = vector.load %arg6[%c1_119, %c0_120, %c0_121] : memref<2x1x32xf32, #tpu.memory_space<vmem>>, vector<1x1x32xf32>
    %288 = vector.shape_cast %287 : vector<1x1x32xf32> to vector<1x32xf32>
    %289 = arith.mulf %286, %286 : vector<16x32xf32>
    %cst_122 = arith.constant dense<0.000000e+00> : vector<16xf32>
    %290 = vector.multi_reduction <add>, %289, %cst_122 [1] : vector<16x32xf32> to vector<16xf32>
    %291 = vector.shape_cast %290 : vector<16xf32> to vector<16x1xf32>
    %cst_123 = arith.constant 3.200000e+01 : f32
    %292 = vector.broadcast %cst_123 : f32 to vector<16x1xf32>
    %293 = arith.divf %291, %292 : vector<16x1xf32>
    %cst_124 = arith.constant 9.99999997E-7 : f32
    %294 = vector.broadcast %cst_124 : f32 to vector<16x1xf32>
    %295 = arith.addf %293, %294 : vector<16x1xf32>
    %296 = math.rsqrt %295 : vector<16x1xf32>
    %297 = vector.broadcast %296 : vector<16x1xf32> to vector<16x32xf32>
    %298 = arith.mulf %286, %297 : vector<16x32xf32>
    %299 = vector.broadcast %288 : vector<1x32xf32> to vector<16x32xf32>
    %300 = arith.mulf %298, %299 : vector<16x32xf32>
    %301 = arith.truncf %300 : vector<16x32xf32> to vector<16x32xbf16>
    %c1_125 = arith.constant 1 : index
    %c0_126 = arith.constant 0 : index
    %c0_127 = arith.constant 0 : index
    %302 = vector.load %arg7[%c1_125, %c0_126, %c0_127] : memref<2x32x64xbf16, #tpu.memory_space<vmem>>, vector<1x32x64xbf16>
    %303 = vector.shape_cast %302 : vector<1x32x64xbf16> to vector<32x64xbf16>
    %cst_128 = arith.constant dense<0.000000e+00> : vector<16x64xf32>
    %304 = tpu.matmul %301, %303, %cst_128 {dimension_numbers = #tpu.dot_dimension_numbers<[1], [0], [0], [1], [0, 0, 1, 1], [], []>} : vector<16x32xbf16>, vector<32x64xbf16>, vector<16x64xf32> -> vector<16x64xf32>
    %cst_129 = arith.constant 0.000000e+00 : f32
    %305 = vector.broadcast %cst_129 : f32 to vector<16x64xf32>
    %306 = arith.maximumf %304, %305 : vector<16x64xf32>
    %307 = arith.truncf %306 : vector<16x64xf32> to vector<16x64xbf16>
    %c1_130 = arith.constant 1 : index
    %c0_131 = arith.constant 0 : index
    %c0_132 = arith.constant 0 : index
    %308 = vector.load %arg8[%c1_130, %c0_131, %c0_132] : memref<2x64x32xbf16, #tpu.memory_space<vmem>>, vector<1x64x32xbf16>
    %309 = vector.shape_cast %308 : vector<1x64x32xbf16> to vector<64x32xbf16>
    %cst_133 = arith.constant dense<0.000000e+00> : vector<16x32xf32>
    %310 = tpu.matmul %307, %309, %cst_133 {dimension_numbers = #tpu.dot_dimension_numbers<[1], [0], [0], [1], [0, 0, 1, 1], [], []>} : vector<16x64xbf16>, vector<64x32xbf16>, vector<16x32xf32> -> vector<16x32xf32>
    %311 = arith.addf %286, %310 : vector<16x32xf32>
    %c0_134 = arith.constant 0 : index
    %c0_135 = arith.constant 0 : index
    %312 = vector.load %arg9[%c0_134, %c0_135] : memref<1x32xf32, #tpu.memory_space<vmem>>, vector<1x32xf32>
    %313 = arith.mulf %311, %311 : vector<16x32xf32>
    %cst_136 = arith.constant dense<0.000000e+00> : vector<16xf32>
    %314 = vector.multi_reduction <add>, %313, %cst_136 [1] : vector<16x32xf32> to vector<16xf32>
    %315 = vector.shape_cast %314 : vector<16xf32> to vector<16x1xf32>
    %cst_137 = arith.constant 3.200000e+01 : f32
    %316 = vector.broadcast %cst_137 : f32 to vector<16x1xf32>
    %317 = arith.divf %315, %316 : vector<16x1xf32>
    %cst_138 = arith.constant 9.99999997E-7 : f32
    %318 = vector.broadcast %cst_138 : f32 to vector<16x1xf32>
    %319 = arith.addf %317, %318 : vector<16x1xf32>
    %320 = math.rsqrt %319 : vector<16x1xf32>
    %321 = vector.broadcast %320 : vector<16x1xf32> to vector<16x32xf32>
    %322 = arith.mulf %311, %321 : vector<16x32xf32>
    %323 = vector.broadcast %312 : vector<1x32xf32> to vector<16x32xf32>
    %324 = arith.mulf %322, %323 : vector<16x32xf32>
    %c0_139 = arith.constant 0 : index
    %c0_140 = arith.constant 0 : index
    %325 = vector.load %arg10[%c0_139, %c0_140] : memref<16x32xf32, #tpu.memory_space<vmem>>, vector<16x32xf32>
    tpu.vector_store %arg10[%c0_139, %c0_140], %324 {strides = array<i32>} : memref<16x32xf32, #tpu.memory_space<vmem>>, vector<16x32xf32>,
    return
  }
}

</mosaic_0001>

<bundles_post_ra>
// kernel: tpu_custom_call.1
= control target key start
LH: loop header
LB: loop body
LE: loop exit
PB: predicated region body
PF: predicated region fallthrough
CT: control target
= control target key end

     0   :  { %15 = vsyncpa [#allocation3], 0  ;;  %s5026_s0 = inlined_call_operand.hbm [shape: f32[16,32], index: 0, kind: input, shape index: {}]   ;;  %s5027_s1 = inlined_call_operand.vmem [shape: f32[2,1,8], index: 1, kind: input, shape index: {}]   ;;  %s5028_s2 = inlined_call_operand.vmem [shape: f32[4,8,8], index: 2, kind: input, shape index: {}]   ;;  %s5029_s3 = inlined_call_operand.vmem [shape: bf16[2,32,96], index: 3, kind: input, shape index: {}]   ;;  %s5030_s4 = inlined_call_operand.vmem [shape: bf16[2,4,8,32], index: 4, kind: input, shape index: {}]   ;;  %s5031_s5 = inlined_call_operand.vmem [shape: f32[2,1,32], index: 5, kind: input, shape index: {}]   ;;  %s5032_s6 = inlined_call_operand.vmem [shape: f32[2,1,32], index: 6, kind: input, shape index: {}]   ;;  %s5033_s7 = inlined_call_operand.hbm [shape: bf16[2,32,64], index: 7, kind: input, shape index: {}]   ;;  %s5034_s8 = inlined_call_operand.vmem [shape: bf16[2,64,32], index: 8, kind: input, shape index: {}]   ;;  %s5035_s9 = inlined_call_operand.vmem [shape: f32[1,32], index: 9, kind: input, shape index: {}]   ;;  %s5036_s10 = inlined_call_operand.hbm [shape: f32[16,32], index: 10, kind: output, shape index: {}]  }
   0x1   :  { %16 = vsyncpa [#allocation6], 0 }
   0x2   :  { %17 = vsyncpa [#allocation4], 0  ;;  %s4370_s13 = smov [#allocation2]   ;;  %s4298_s17 = scalar_lea.hbm %s5026_s0, 256 }
   0x3   :  { %s23_s14 = sshll.u32 %s4370_s13, 4  ;;  %p4299_p0 = scmp.ne.s32.totalorder %s5026_s0, %s4298_s17  ;;  %s24_s14 = int_to_ptr.vmem [resolvable:$true] %s23_s14 }
   0x4   :  { %p4302_p1 = scmp.lt.u32.totalorder %s4298_s17, %s5026_s0 }
   0x6   :  { %p4304_p2 = pnand %p4302_p1, %p4299_p0 }
   0x8   :  { %4307 = shalt.err (!%p4304_p2)
}
   0x9   :  { %s4308_s22 = scalar_lea.vmem %s24_s14, 256  ;;  %p4313_p4 = scmp.lt.s32.totalorder %s24_s14, %s24_s14 }
   0xa   :  { %p4309_p3 = scmp.ne.s32.totalorder %s24_s14, %s4308_s22  ;;  %p4314_p5 = scmp.lt.s32.totalorder %s4308_s22, %s4308_s22 }
   0xc   :  { %p4315_p6 = por %p4314_p5, %p4313_p4 }
   0xe   :  { %p4316_p7 = pnand %p4315_p6, %p4309_p3 }
  0x10   :  { %4319 = shalt.err (!%p4316_p7)
}
  0x11   :  { %s4371_s23 = smov 128   ;;  %s4372_s24 = smov 8  }
  0x12   :  { %29 = dma.hbm_to_vmem [thread:$0]  %s5026_s0, 256, %s24_s14, [#allocation3], %s4371_s23, %s4371_s23, %s4372_s24  }
  0x13   :  { %s4373_s27 = smov [#allocation5]   ;;  %s4320_s11 = scalar_lea.hbm %s5033_s7, 512 }
  0x14   :  { %s47_s28 = sshll.u32 %s4373_s27, 4  ;;  %p4321_p8 = scmp.ne.s32.totalorder %s5033_s7, %s4320_s11  ;;  %s48_s28 = int_to_ptr.vmem [resolvable:$true] %s47_s28 }
  0x15   :  { %p4324_p9 = scmp.lt.u32.totalorder %s4320_s11, %s5033_s7 }
  0x17   :  { %p4326_p10 = pnand %p4324_p9, %p4321_p8 }
  0x19   :  { %4329 = shalt.err (!%p4326_p10)
}
  0x1a   :  { %s4330_s17 = scalar_lea.vmem %s48_s28, 512  ;;  %p4335_p12 = scmp.lt.s32.totalorder %s48_s28, %s48_s28 }
  0x1b   :  { %p4331_p11 = scmp.ne.s32.totalorder %s48_s28, %s4330_s17  ;;  %p4336_p13 = scmp.lt.s32.totalorder %s4330_s17, %s4330_s17 }
  0x1d   :  { %p4337_p0 = por %p4336_p13, %p4335_p12 }
  0x1f   :  { %p4338_p1 = pnand %p4337_p0, %p4331_p11 }
  0x21   :  { %4341 = shalt.err (!%p4338_p1)
}
  0x22   :  { %s4374_s0 = smov 64   ;;  %s4375_s14 = smov 4  }
  0x23   :  { %53 = dma.hbm_to_vmem [thread:$0]  %s5033_s7, 512, %s48_s28, [#allocation6], %s4374_s0, %s4374_s0, %s4375_s14  }
  0x24   :  { %4364 = dma.done.wait [#allocation3], 256  }
  0x25   :  { %4365 = vsyncadd [#allocation3], 4294967040 }
  0x26   :  { %4366 = dma.done.wait [#allocation6], 512  }
  0x27   :  { %4367 = vsyncadd [#allocation6], 4294966784  ;;  %v4473_v0 = vld [vmem:[#allocation2] sm:$0xff]  ;;  %vm99_vm0 = vcmask 261120   ;;  %v4475_v1 = vld [vmem:[#allocation2 + $0x8] sm:$0xff]  ;;  %v4376_v7 = vmov 0.0  }
  0x28   :  { %v97_v2 = vmul.f32 %v4473_v0, %v4473_v0  ;;  %v98_v3 = vmul.f32 %v4475_v1, %v4475_v1  ;;  %v4198_v6 = vld [vmem:[%s5029_s3] sm:$0xff]   ;;  %3915 = vmatprep.subr.bf16.mxu0 %v4376_v7  ;;  %vm4377_vm1 = vmmov 0   ;;  %v4199_v8 = vld [vmem:[%s5029_s3 + $0x8] sm:$0xff]   ;;  %3923 = vmatprep.subr.mxu1 %v4376_v7  ;;  %s4378_s27 = smov 96   ;;  %vm187_vm2 = vcmask 64512   ;;  %s4379_s15 = smov 88  }
  0x29   :  { %3919 = vmatprep.mubr.msk.bf16.mxu0 %vm4377_vm1, %v4376_v7  ;;  %3916 = vmatpush3.bf16.msra.mxu0 %v4198_v6  ;;  %v3709_v18 = vld [vmem:[%s5031_s5] ss:$0 sm:$0xff]  ;;  %v4539_v32 = vld [vmem:[%s5027_s1 + $0x1] ss:$0 sm:$0xff]  ;;  %s4381_s14 = smov 56   ;;  %s4382_s18 = smov 80  }
  0x2a   :  { %v100_v4 = vsel %vm99_vm0, %v97_v2, 0.0  ;;  %v103_v5 = vsel %vm99_vm0, %v98_v3, 0.0  ;;  %3917 = vmatprep.subr.bf16.mxu0 %v4376_v7  ;;  %3925 = vmatprep.mubr.msk.f32.mxu1 %vm4377_vm1, %v4376_v7  ;;  %v4528_v29 = vld [vmem:[%s5027_s1] ss:$0 sm:$0xff]  ;;  %s4380_s1 = smov 120   ;;  %s4383_s19 = smov 112  }
  0x2b   :  { %101 = vadd.xlane.f32.xlu0 %v100_v4  ;;  %v69_v30 = vld [vmem:[%s5028_s2] sm:$0xff]  ;;  %v3706_v4 = vld [vmem:[%s5028_s2 + $0x8] sm:$0xff]  ;;  %s4384_s7 = smov 72   ;;  %vm851_vm3 = vcmask 1043456   ;;  %s4385_s29 = smov 48   ;;  %vm1830_vm4 = vcmask 523264  }
  0x2c   :  { %v4534_v31 = vadd.f32 %v4528_v29, %v69_v30  ;;  %v4543_v36 = vadd.f32 %v4539_v32, %v69_v30  ;;  %s4386_s30 = smov 104   ;;  %s4387_s11 = smov 40  }
  0x2d   :  { %3918 = vmatpush3.bf16.msra.mxu0 %v4199_v8  ;;  %s4388_s17 = smov [#allocation7]  }
  0x2e   :  { %3948 = vmatprep.subr.mxu0 %v4376_v7  ;;  %s3691_s20 = sshll.u32 %s4388_s17, 4  ;;  %s3692_s20 = int_to_ptr.vmem [resolvable:$true] %s3691_s20 }
  0x2f   :  { %104 = vadd.xlane.f32.xlu0 %v103_v5  ;;  %v4584_v5 = vadd.f32 %v3706_v4, %v4539_v32  ;;  %s4342_s21 = scalar_lea.vmem %s3692_s20, 256  ;;  %p4347_p3 = scmp.lt.s32.totalorder %s3692_s20, %s3692_s20 }
  0x30   :  { %p4343_p2 = scmp.ne.s32.totalorder %s3692_s20, %s4342_s21  ;;  %p4348_p4 = scmp.lt.s32.totalorder %s4342_s21, %s4342_s21 }
  0x32   :  { %p4349_p5 = por %p4348_p4, %p4347_p3 }
  0x34   :  { %p4350_p6 = pnand %p4349_p5, %p4343_p2 }
  0xb8   :  { %v102_v9 = vpop.xlane.xlu0 %101 }
  0xb9   :  { %v107_v10 = vmul.f32 0.03125, %v102_v9 }
  0xbb   :  { %v109_v11 = vadd.f32 1e-06, %v107_v10 }
  0xbc   :  { %v105_v12 = vpop.xlane.xlu0 %104 }
  0xbd   :  { %4214 = vrsqrt.f32 %v109_v11  ;;  %v108_v13 = vmul.f32 0.03125, %v105_v12 }
  0xbf   :  { %v110_v14 = vadd.f32 1e-06, %v108_v13 }
  0xc1   :  { %4216 = vrsqrt.f32 %v110_v14  ;;  %v4589_v14 = vadd.f32 %v3706_v4, %v4528_v29 }
  0xc7   :  { %v4215_v15 = vpop.eup %4214 }
  0xc8   :  { %v113_v16 = vmul.f32 %v4215_v15, %v4473_v0 }
  0xca   :  { %v121_v20 = vmul.f32 %v3709_v18, %v113_v16 }
  0xcb   :  { %v4217_v17 = vpop.eup %4216 }
  0xcc   :  { %v114_v19 = vmul.f32 %v4217_v17, %v4475_v1 }
  0xce   :  { %v122_v21 = vmul.f32 %v3709_v18, %v114_v19 }
  0xd0   :  { %v123_v22 = vpack.c.bf16 %v122_v21, %v121_v20 }
  0xd2   :  { %3920 = vmatmul.mubr.msk.bf16.vlgmr.msra.gmra.mrb[0].mxu0 %vm99_vm0, %v123_v22 }
  0xd3   :  { %3950 = vmatprep.mubr.msk.f32.mxu0 %vm4377_vm1, %v4376_v7 }
 0x1a5   :  { %v4505_v23 = vpop.f32.mrb[0].mxu0 }
 0x1a6   :  { %185 = vrot.lane.b32.xlu1 %v4505_v23, %s4378_s27  ;;  %v3921_v24 = vpop.f32.mrb[1].mxu0 }
 0x1a7   :  { %v4509_v25 = vpop.f32.mrb[2].mxu0 }
 0x1a8   :  { %v3922_v26 = vpop.f32.mrb[3].mxu0 }
 0x1aa   :  { %263 = vrot.lane.b32.xlu1 %v4509_v25, %s4378_s27 }
 0x218   :  { %v186_v27 = vpop.permute.xlu1 %185 }
 0x219   :  { %3924 = vmatpush3.xpose.msk.msra.mxu1 %vm187_vm2, %v186_v27 }
 0x21a   :  { %3928 = vmatprep.subr.mxu1 %v4376_v7 }
 0x21c   :  { %3926 = vmatmul.mubr.msk.f32.vlgmr.msra.gmra.mrb[0].mxu1 %vm187_vm2, %v4505_v23  ;;  %v264_v28 = vpop.permute.xlu1 %263 }
 0x21d   :  { %3929 = vmatpush3.xpose.msk.msra.mxu1 %vm187_vm2, %v264_v28  ;;  %3930 = vmatprep.mubr.msk.f32.mxu1 %vm4377_vm1, %v4376_v7 }
 0x21e   :  { %3933 = vmatprep.subr.mxu1 %v4376_v7 }
 0x220   :  { %3931 = vmatmul.mubr.msk.f32.vlgmr.msra.gmra.mrb[2].mxu1 %vm187_vm2, %v4509_v25 }
 0x221   :  { %3935 = vmatprep.mubr.msk.f32.mxu1 %vm4377_vm1, %v4376_v7 }
 0x2ef   :  { %v258_v33 = vpop.f32.mrb[0].mxu1 }
 0x2f0   :  { %v259_v34 = vadd.f32 %v258_v33, %v4534_v31  ;;  %v3927_v35 = vpop.f32.mrb[1].mxu1 }
 0x2f2   :  { %v339_v37 = vsel %vm187_vm2, %v259_v34, -inf }
 0x2f3   :  { %340 = vmax.xlane.f32.xlu0 %v339_v37  ;;  %v335_v38 = vpop.f32.mrb[2].mxu1  ;;  %v514_v37 = vld [vmem:[%s5030_s4] sm:$0xf] }
 0x2f4   :  { %v336_v39 = vadd.f32 %v335_v38, %v4543_v36  ;;  %v3932_v40 = vpop.f32.mrb[3].mxu1 }
 0x2f5   :  { %v900_v40 = vsel %vm851_vm3, %v514_v37, 0 }
 0x2f6   :  { %v342_v41 = vsel %vm187_vm2, %v336_v39, -inf }
 0x2f7   :  { %343 = vmax.xlane.f32.xlu1 %v342_v41 }
 0x308   :  { %517 = vrot.lane.b32.xlu1 %v4505_v23, %s4379_s15 }
 0x309   :  { %361 = vrot.lane.b32.xlu0 %v4505_v23, %s4374_s0 }
 0x30d   :  { %437 = vrot.lane.b32.xlu0 %v4509_v25, %s4374_s0 }
 0x311   :  { %595 = vrot.lane.b32.xlu0 %v4509_v25, %s4379_s15 }
 0x380   :  { %v341_v42 = vpop.xlane.xlu0 %340 }
 0x381   :  { %v345_v43 = vsub.f32 %v259_v34, %v341_v42 }
 0x383   :  { %v347_v44 = vmul.f32 1.442695, %v345_v43 }
 0x384   :  { %v362_v45 = vpop.permute.xlu0 %361  ;;  %v344_v50 = vpop.xlane.xlu1 %343 }
 0x385   :  { %4218 = vpow2.f32 %v347_v44  ;;  %3934 = vmatpush3.msra.mxu1 %v362_v45  ;;  %v346_v51 = vsub.f32 %v336_v39, %v344_v50 }
 0x386   :  { %3938 = vmatprep.subr.mxu1 %v4376_v7 }
 0x387   :  { %v349_v52 = vmul.f32 1.442695, %v346_v51 }
 0x388   :  { %v438_v46 = vpop.permute.xlu0 %437  ;;  %v518_v63 = vpop.permute.xlu1 %517 }
 0x389   :  { %4220 = vpow2.f32 %v349_v52 }
 0x38c   :  { %v596_v47 = vpop.permute.xlu0 %595 }
 0x38d   :  { %3949 = vmatpush3.xpose.msk.msra.mxu0 %vm187_vm2, %v596_v47  ;;  %v3725_v47 = vld [vmem:[%s5030_s4 + $0x4] sm:$0xf] }
 0x38e   :  { %3958 = vmatprep.subr.mxu0 %v4376_v7 }
 0x38f   :  { %v4219_v48 = vpop.eup %4218 }
 0x390   :  { %v351_v49 = vsel %vm187_vm2, %v4219_v48, 0.0 }
 0x391   :  { %352 = vadd.xlane.f32.xlu0 %v351_v49 }
 0x393   :  { %v4221_v53 = vpop.eup %4220 }
 0x394   :  { %v354_v54 = vsel %vm187_vm2, %v4221_v53, 0.0 }
 0x3a7   :  { %515 = vrot.lane.b32.xlu0 %v4505_v23, %s4380_s1 }
 0x3c6   :  { %355 = vadd.xlane.f32.xlu0 %v354_v54 }
 0x3dc   :  { %593 = vrot.lane.b32.xlu0 %v4509_v25, %s4380_s1 }
 0x41e   :  { %v353_v55 = vpop.xlane.xlu0 %352 }
 0x41f   :  { %4222 = vrcp.f32 %v353_v55  ;;  %v3707_v55 = vld [vmem:[%s5028_s2 + $0x10] sm:$0xff] }
 0x422   :  { %v516_v58 = vpop.permute.xlu0 %515 }
 0x429   :  { %v4223_v56 = vpop.eup %4222 }
 0x42a   :  { %v359_v57 = vmul.f32 %v4223_v56, %v4219_v48  ;;  %v853_v48 = vsel %vm851_vm3, %v3725_v47, 0  ;;  %v4639_v56 = vadd.f32 %v3707_v55, %v4539_v32 }
 0x42c   :  { %3936 = vmatmul.mubr.msk.f32.vlgmr.msra.gmra.mrb[4].mxu1 %vm187_vm2, %v359_v57 }
 0x42d   :  { %3939 = vmatpush3.msra.mxu1 %v438_v46  ;;  %3940 = vmatprep.mubr.msk.f32.mxu1 %vm4377_vm1, %v4376_v7 }
 0x42e   :  { %3943 = vmatprep.subr.mxu1 %v4376_v7 }
 0x453   :  { %v356_v59 = vpop.xlane.xlu0 %355 }
 0x454   :  { %4224 = vrcp.f32 %v356_v59 }
 0x457   :  { %v594_v60 = vpop.permute.xlu0 %593 }
 0x458   :  { %3951 = vmatmul.mubr.msk.f32.vlgmr.msra.gmra.mrb[4].mxu0 %vm187_vm2, %v594_v60 }
 0x459   :  { %3960 = vmatprep.mubr.msk.f32.mxu0 %vm4377_vm1, %v4376_v7 }
 0x45e   :  { %v4225_v61 = vpop.eup %4224 }
 0x45f   :  { %v360_v62 = vmul.f32 %v4225_v61, %v4221_v53 }
 0x461   :  { %3941 = vmatmul.mubr.msk.f32.vlgmr.msra.gmra.mrb[6].mxu1 %vm187_vm2, %v360_v62 }
 0x462   :  { %3944 = vmatpush3.xpose.msk.msra.mxu1 %vm187_vm2, %v518_v63  ;;  %3945 = vmatprep.mubr.msk.f32.mxu1 %vm4377_vm1, %v4376_v7 }
 0x463   :  { %3953 = vmatprep.subr.mxu1 %v4376_v7 }
 0x465   :  { %3946 = vmatmul.mubr.msk.f32.vlgmr.msra.gmra.mrb[8].mxu1 %vm187_vm2, %v516_v58 }
 0x466   :  { %3955 = vmatprep.mubr.msk.f32.mxu1 %vm4377_vm1, %v4376_v7 }
 0x4ff   :  { %v433_v2 = vpop.f32.mrb[4].mxu1 }
 0x500   :  { %v3937_v3 = vpop.f32.mrb[5].mxu1 }
 0x52b   :  { %v667_v6 = vpop.f32.mrb[4].mxu0 }
 0x52c   :  { %v668_v8 = vadd.f32 %v667_v6, %v4584_v5  ;;  %v3952_v9 = vpop.f32.mrb[5].mxu0 }
 0x52e   :  { %v674_v10 = vsel %vm187_vm2, %v668_v8, -inf }
 0x52f   :  { %675 = vmax.xlane.f32.xlu1 %v674_v10 }
 0x534   :  { %v509_v11 = vpop.f32.mrb[6].mxu1 }
 0x535   :  { %v513_v12 = vpack.c.bf16 %v509_v11, %v433_v2  ;;  %v3942_v13 = vpop.f32.mrb[7].mxu1 }
 0x538   :  { %v589_v15 = vpop.f32.mrb[8].mxu1 }
 0x539   :  { %v590_v16 = vadd.f32 %v589_v15, %v4589_v14  ;;  %v3947_v17 = vpop.f32.mrb[9].mxu1 }
 0x53b   :  { %v671_v18 = vsel %vm187_vm2, %v590_v16, -inf }
 0x53c   :  { %672 = vmax.xlane.f32.xlu0 %v671_v18 }
 0x540   :  { %769 = vrot.lane.b32.xlu1 %v4509_v25, %s4381_s14 }
 0x544   :  { %1023 = vrot.lane.b32.xlu1 %v4509_v25, %s4382_s18 }
 0x548   :  { %1021 = vrot.lane.b32.xlu1 %v4509_v25, %s4383_s19 }
 0x54c   :  { %943 = vrot.lane.b32.xlu1 %v4505_v23, %s4383_s19 }
 0x550   :  { %1327 = vrot.lane.b32.xlu1 %v4505_v23, %s4384_s7 }
 0x5bc   :  { %v676_v19 = vpop.xlane.xlu1 %675 }
 0x5bd   :  { %v678_v20 = vsub.f32 %v668_v8, %v676_v19  ;;  %v4666_v19 = vadd.f32 %v3707_v55, %v4528_v29 }
 0x5bf   :  { %v681_v21 = vmul.f32 1.442695, %v678_v20 }
 0x5c0   :  { %v770_v22 = vpop.permute.xlu1 %769 }
 0x5c1   :  { %4226 = vpow2.f32 %v681_v21  ;;  %3959 = vmatpush3.msra.mxu0 %v770_v22 }
 0x5c2   :  { %3969 = vmatprep.subr.bf16.mxu0 %v4376_v7 }
 0x5c4   :  { %v1024_v43 = vpop.permute.xlu1 %1023 }
 0x5c8   :  { %v1022_v46 = vpop.permute.xlu1 %1021 }
 0x5c9   :  { %v673_v24 = vpop.xlane.xlu0 %672 }
 0x5ca   :  { %v677_v26 = vsub.f32 %v590_v16, %v673_v24 }
 0x5cb   :  { %v4227_v27 = vpop.eup %4226 }
 0x5cc   :  { %v679_v28 = vmul.f32 1.442695, %v677_v26  ;;  %v686_v30 = vsel %vm187_vm2, %v4227_v27, 0.0  ;;  %v944_v3 = vpop.permute.xlu1 %943 }
 0x5cd   :  { %687 = vadd.xlane.f32.xlu0 %v686_v30 }
 0x5ce   :  { %4228 = vpow2.f32 %v679_v28 }
 0x5d0   :  { %v1328_v26 = vpop.permute.xlu1 %1327 }
 0x5d8   :  { %v4229_v33 = vpop.eup %4228 }
 0x5d9   :  { %v683_v34 = vsel %vm187_vm2, %v4229_v33, 0.0 }
 0x5da   :  { %684 = vadd.xlane.f32.xlu0 %v683_v34 }
 0x5f0   :  { %693 = vrot.lane.b32.xlu0 %v4505_v23, %s4381_s14 }
 0x5f4   :  { %945 = vrot.lane.b32.xlu0 %v4505_v23, %s4382_s18 }
 0x65a   :  { %v688_v35 = vpop.xlane.xlu0 %687 }
 0x65b   :  { %4230 = vrcp.f32 %v688_v35 }
 0x665   :  { %v4231_v38 = vpop.eup %4230 }
 0x666   :  { %v692_v39 = vmul.f32 %v4231_v38, %v4227_v27 }
 0x667   :  { %v685_v41 = vpop.xlane.xlu0 %684 }
 0x668   :  { %4232 = vrcp.f32 %v685_v41  ;;  %3961 = vmatmul.mubr.msk.f32.vlgmr.msra.gmra.mrb[6].mxu0 %vm187_vm2, %v692_v39 }
 0x669   :  { %3970 = vmatpush3.bf16.msra.mxu0 %v900_v40  ;;  %3971 = vmatprep.mubr.msk.bf16.mxu0 %vm4377_vm1, %v4376_v7 }
 0x66a   :  { %3980 = vmatprep.subr.mxu0 %v4376_v7 }
 0x66b   :  { %v694_v42 = vpop.permute.xlu0 %693 }
 0x66c   :  { %3954 = vmatpush3.msra.mxu1 %v694_v42  ;;  %3972 = vmatmul.mubr.msk.bf16.vlgmr.msra.gmra.mrb[8].mxu0 %vm187_vm2, %v513_v12 }
 0x66d   :  { %3982 = vmatprep.mubr.msk.f32.mxu0 %vm4377_vm1, %v4376_v7  ;;  %3963 = vmatprep.subr.bf16.mxu1 %v4376_v7 }
 0x66f   :  { %v946_v63 = vpop.permute.xlu0 %945 }
 0x672   :  { %v4233_v44 = vpop.eup %4232  ;;  %3981 = vmatpush3.xpose.msk.msra.mxu0 %vm187_vm2, %v1024_v43  ;;  %v3708_v43 = vld [vmem:[%s5028_s2 + $0x18] sm:$0xff] }
 0x673   :  { %v691_v45 = vmul.f32 %v4233_v44, %v4229_v33  ;;  %3990 = vmatprep.subr.mxu0 %v4376_v7  ;;  %v4692_v47 = vadd.f32 %v3708_v43, %v4528_v29 }
 0x675   :  { %3983 = vmatmul.mubr.msk.f32.vlgmr.msra.gmra.mrb[12].mxu0 %vm187_vm2, %v1022_v46  ;;  %3956 = vmatmul.mubr.msk.f32.vlgmr.msra.gmra.mrb[10].mxu1 %vm187_vm2, %v691_v45 }
 0x676   :  { %3965 = vmatprep.mubr.msk.bf16.mxu1 %vm4377_vm1, %v4376_v7  ;;  %3992 = vmatprep.mubr.msk.f32.mxu0 %vm4377_vm1, %v4376_v7 }
 0x677   :  { %3964 = vmatpush3.bf16.msra.mxu1 %v853_v48 }
 0x678   :  { %3975 = vmatprep.subr.mxu1 %v4376_v7 }
 0x73b   :  { %v841_v49 = vpop.f32.mrb[6].mxu0 }
 0x73c   :  { %v3962_v50 = vpop.f32.mrb[7].mxu0 }
 0x73f   :  { %v936_v51 = vpop.f32.mrb[8].mxu0 }
 0x740   :  { %v3973_v52 = vpop.f32.mrb[9].mxu0 }
 0x741   :  { %v939_v53 = vpop.f32.mrb[10].mxu0 }
 0x742   :  { %v3974_v54 = vpop.f32.mrb[11].mxu0 }
 0x748   :  { %v1095_v57 = vpop.f32.mrb[12].mxu0  ;;  %v765_v58 = vpop.f32.mrb[10].mxu1 }
 0x749   :  { %v1096_v59 = vadd.f32 %v1095_v57, %v4639_v56  ;;  %v845_v60 = vpack.c.bf16 %v841_v49, %v765_v58  ;;  %v3984_v61 = vpop.f32.mrb[13].mxu0  ;;  %v3957_v62 = vpop.f32.mrb[11].mxu1 }
 0x74b   :  { %3966 = vmatmul.mubr.msk.bf16.vlgmr.msra.gmra.mrb[12].mxu1 %vm187_vm2, %v845_v60  ;;  %v1102_v2 = vsel %vm187_vm2, %v1096_v59, -inf }
 0x74c   :  { %3976 = vmatpush3.xpose.msk.msra.mxu1 %vm187_vm2, %v946_v63  ;;  %1103 = vmax.xlane.f32.xlu0 %v1102_v2 }
 0x74d   :  { %3977 = vmatprep.mubr.msk.f32.mxu1 %vm4377_vm1, %v4376_v7  ;;  %3985 = vmatprep.subr.mxu1 %v4376_v7 }
 0x753   :  { %3978 = vmatmul.mubr.msk.f32.vlgmr.msra.gmra.mrb[16].mxu1 %vm187_vm2, %v944_v3 }
 0x754   :  { %3987 = vmatprep.mubr.msk.f32.mxu1 %vm4377_vm1, %v4376_v7 }
 0x762   :  { %1197 = vrot.lane.b32.xlu0 %v4509_v25, %s4385_s29 }
 0x766   :  { %1325 = vrot.lane.b32.xlu0 %v4505_v23, %s4386_s30 }
 0x76a   :  { %1403 = vrot.lane.b32.xlu0 %v4509_v25, %s4386_s30 }
 0x7d9   :  { %v1104_v4 = vpop.xlane.xlu0 %1103 }
 0x7da   :  { %v1106_v6 = vsub.f32 %v1096_v59, %v1104_v4 }
 0x7dc   :  { %v1109_v8 = vmul.f32 1.442695, %v1106_v6 }
 0x7dd   :  { %v1198_v9 = vpop.permute.xlu0 %1197 }
 0x7de   :  { %4234 = vpow2.f32 %v1109_v8  ;;  %3991 = vmatpush3.msra.mxu0 %v1198_v9 }
 0x7df   :  { %4001 = vmatprep.subr.mxu0 %v4376_v7 }
 0x7e1   :  { %v1326_v33 = vpop.permute.xlu0 %1325 }
 0x7e5   :  { %v1404_v35 = vpop.permute.xlu0 %1403 }
 0x7e8   :  { %v4235_v10 = vpop.eup %4234 }
 0x7e9   :  { %v1114_v11 = vsel %vm187_vm2, %v4235_v10, 0.0 }
 0x7ea   :  { %1115 = vadd.xlane.f32.xlu1 %v1114_v11 }
 0x7fb   :  { %1405 = vrot.lane.b32.xlu1 %v4509_v25, %s4384_s7 }
 0x81e   :  { %v889_v12 = vpop.f32.mrb[12].mxu1 }
 0x81f   :  { %v4661_v13 = vadd.f32 %v936_v51, %v889_v12  ;;  %v3967_v15 = vpop.f32.mrb[13].mxu1  ;;  %v4697_v51 = vadd.f32 %v3708_v43, %v4539_v32  ;;  %v3734_v32 = vld [vmem:[%s5030_s4 + $0x8] sm:$0xf] }
 0x820   :  { %v892_v16 = vpop.f32.mrb[14].mxu1  ;;  %v1280_v59 = vsel %vm851_vm3, %v3734_v32, 0 }
 0x821   :  { %v4663_v17 = vadd.f32 %v939_v53, %v892_v16  ;;  %v3968_v18 = vpop.f32.mrb[15].mxu1 }
 0x826   :  { %v1017_v20 = vpop.f32.mrb[16].mxu1 }
 0x827   :  { %v1018_v21 = vadd.f32 %v1017_v20, %v4666_v19  ;;  %v3979_v22 = vpop.f32.mrb[17].mxu1 }
 0x829   :  { %v1099_v24 = vsel %vm187_vm2, %v1018_v21, -inf }
 0x82a   :  { %1100 = vmax.xlane.f32.xlu1 %v1099_v24  ;;  %v3742_v24 = vld [vmem:[%s5030_s4 + $0xc] sm:$0xf] }
 0x877   :  { %v1116_v27 = vpop.xlane.xlu1 %1115 }
 0x878   :  { %4236 = vrcp.f32 %v1116_v27 }
 0x87b   :  { %v1406_v34 = vpop.permute.xlu1 %1405 }
 0x882   :  { %v4237_v28 = vpop.eup %4236 }
 0x883   :  { %v1120_v30 = vmul.f32 %v4237_v28, %v4235_v10 }
 0x885   :  { %3993 = vmatmul.mubr.msk.f32.vlgmr.msra.gmra.mrb[14].mxu0 %vm187_vm2, %v1120_v30 }
 0x886   :  { %4002 = vmatpush3.xpose.msk.msra.mxu0 %vm187_vm2, %v1328_v26  ;;  %4003 = vmatprep.mubr.msk.f32.mxu0 %vm4377_vm1, %v4376_v7  ;;  %v1662_v26 = vsel %vm851_vm3, %v3742_v24, 0 }
 0x887   :  { %4006 = vmatprep.subr.mxu0 %v4376_v7 }
 0x889   :  { %4004 = vmatmul.mubr.msk.f32.vlgmr.msra.gmra.mrb[16].mxu0 %vm187_vm2, %v1326_v33 }
 0x88a   :  { %4007 = vmatpush3.xpose.msk.msra.mxu0 %vm187_vm2, %v1406_v34  ;;  %4008 = vmatprep.mubr.msk.f32.mxu0 %vm4377_vm1, %v4376_v7 }
 0x88b   :  { %4016 = vmatprep.subr.mxu0 %v4376_v7 }
 0x88d   :  { %4009 = vmatmul.mubr.msk.f32.vlgmr.msra.gmra.mrb[18].mxu0 %vm187_vm2, %v1404_v35 }
 0x88e   :  { %4018 = vmatprep.mubr.msk.f32.mxu0 %vm4377_vm1, %v4376_v7 }
 0x8b7   :  { %v1101_v37 = vpop.xlane.xlu1 %1100 }
 0x8b8   :  { %v1105_v38 = vsub.f32 %v1018_v21, %v1101_v37 }
 0x8ba   :  { %v1107_v39 = vmul.f32 1.442695, %v1105_v38 }
 0x8bc   :  { %4238 = vpow2.f32 %v1107_v39 }
 0x8c6   :  { %v4239_v40 = vpop.eup %4238 }
 0x8c7   :  { %v1111_v41 = vsel %vm187_vm2, %v4239_v40, 0.0 }
 0x8c8   :  { %1112 = vadd.xlane.f32.xlu0 %v1111_v41 }
 0x8de   :  { %1121 = vrot.lane.b32.xlu0 %v4505_v23, %s4385_s29 }
 0x8e2   :  { %1579 = vrot.lane.b32.xlu0 %v4509_v25, %s4387_s11 }
 0x955   :  { %v1113_v42 = vpop.xlane.xlu0 %1112 }
 0x956   :  { %4240 = vrcp.f32 %v1113_v42 }
 0x958   :  { %v1269_v44 = vpop.f32.mrb[14].mxu0 }
 0x959   :  { %v3994_v45 = vpop.f32.mrb[15].mxu0  ;;  %v1122_v46 = vpop.permute.xlu0 %1121 }
 0x95a   :  { %3986 = vmatpush3.msra.mxu1 %v1122_v46 }
 0x95b   :  { %3995 = vmatprep.subr.bf16.mxu1 %v4376_v7 }
 0x95c   :  { %v1399_v48 = vpop.f32.mrb[16].mxu0 }
 0x95d   :  { %v1400_v49 = vadd.f32 %v1399_v48, %v4692_v47  ;;  %v4005_v50 = vpop.f32.mrb[17].mxu0  ;;  %v1580_v25 = vpop.permute.xlu0 %1579 }
 0x95e   :  { %4017 = vmatpush3.msra.mxu0 %v1580_v25 }
 0x95f   :  { %v1481_v52 = vsel %vm187_vm2, %v1400_v49, -inf  ;;  %4027 = vmatprep.subr.bf16.mxu0 %v4376_v7 }
 0x960   :  { %v4241_v53 = vpop.eup %4240  ;;  %1482 = vmax.xlane.f32.xlu1 %v1481_v52  ;;  %v1477_v29 = vpop.f32.mrb[18].mxu0 }
 0x961   :  { %v1119_v54 = vmul.f32 %v4241_v53, %v4239_v40  ;;  %v1478_v55 = vadd.f32 %v1477_v29, %v4697_v51  ;;  %v4010_v57 = vpop.f32.mrb[19].mxu0  ;;  %v4200_v53 = vld [vmem:[#allocation5] sm:$0xff]   ;;  %v4201_v29 = vld [vmem:[#allocation5 + $0x8] sm:$0xff]  }
 0x963   :  { %3988 = vmatmul.mubr.msk.f32.vlgmr.msra.gmra.mrb[18].mxu1 %vm187_vm2, %v1119_v54  ;;  %v1484_v58 = vsel %vm187_vm2, %v1478_v55, -inf }
 0x964   :  { %1485 = vmax.xlane.f32.xlu1 %v1484_v58  ;;  %3997 = vmatprep.mubr.msk.bf16.mxu1 %vm4377_vm1, %v4376_v7 }
 0x965   :  { %3996 = vmatpush3.bf16.msra.mxu1 %v1280_v59 }
 0x966   :  { %4011 = vmatprep.subr.mxu1 %v4376_v7 }
 0x9ed   :  { %v1483_v60 = vpop.xlane.xlu1 %1482 }
 0x9ee   :  { %v1487_v61 = vsub.f32 %v1400_v49, %v1483_v60 }
 0x9f0   :  { %v1489_v62 = vmul.f32 1.442695, %v1487_v61 }
 0x9f1   :  { %v1486_v63 = vpop.xlane.xlu1 %1485 }
 0x9f2   :  { %4242 = vpow2.f32 %v1489_v62  ;;  %v1488_v2 = vsub.f32 %v1478_v55, %v1486_v63  ;;  %v3744_v63 = vld [vmem:[%s5032_s6] ss:$0 sm:$0xff] }
 0x9f4   :  { %v1491_v3 = vmul.f32 1.442695, %v1488_v2 }
 0x9f6   :  { %4244 = vpow2.f32 %v1491_v3 }
 0x9fc   :  { %v4243_v4 = vpop.eup %4242 }
 0x9fd   :  { %v1493_v6 = vsel %vm187_vm2, %v4243_v4, 0.0 }
 0x9fe   :  { %1494 = vadd.xlane.f32.xlu1 %v1493_v6 }
 0xa00   :  { %v4245_v8 = vpop.eup %4244 }
 0xa01   :  { %v1496_v9 = vsel %vm187_vm2, %v4245_v8, 0.0 }
 0xa02   :  { %1497 = vadd.xlane.f32.xlu1 %v1496_v9  ;;  %v4205_v9 = vld [vmem:[%s5034_s8 + $0x18] sm:$0xff]  }
 0xa13   :  { %1503 = vrot.lane.b32.xlu1 %v4505_v23, %s4387_s11 }
 0xa36   :  { %v1193_v10 = vpop.f32.mrb[18].mxu1 }
 0xa37   :  { %v1273_v11 = vpack.c.bf16 %v1269_v44, %v1193_v10  ;;  %v3989_v12 = vpop.f32.mrb[19].mxu1 }
 0xa39   :  { %3998 = vmatmul.mubr.msk.bf16.vlgmr.msra.gmra.mrb[20].mxu1 %vm187_vm2, %v1273_v11 }
 0xa3a   :  { %4013 = vmatprep.mubr.msk.f32.mxu1 %vm4377_vm1, %v4376_v7 }
 0xa8b   :  { %v1495_v15 = vpop.xlane.xlu1 %1494 }
 0xa8c   :  { %4246 = vrcp.f32 %v1495_v15 }
 0xa8f   :  { %v1498_v16 = vpop.xlane.xlu1 %1497 }
 0xa90   :  { %4248 = vrcp.f32 %v1498_v16 }
 0xa93   :  { %v1504_v18 = vpop.permute.xlu1 %1503 }
 0xa94   :  { %4012 = vmatpush3.msra.mxu1 %v1504_v18 }
 0xa95   :  { %4021 = vmatprep.subr.bf16.mxu1 %v4376_v7 }
 0xa96   :  { %v4247_v20 = vpop.eup %4246 }
 0xa97   :  { %v1501_v21 = vmul.f32 %v4247_v20, %v4243_v4 }
 0xa99   :  { %4014 = vmatmul.mubr.msk.f32.vlgmr.msra.gmra.mrb[24].mxu1 %vm187_vm2, %v1501_v21 }
 0xa9a   :  { %v4249_v23 = vpop.eup %4248  ;;  %4023 = vmatprep.mubr.msk.bf16.mxu1 %vm4377_vm1, %v4376_v7  ;;  %4022 = vmatpush3.bf16.msra.mxu1 %v1662_v26 }
 0xa9b   :  { %v1502_v22 = vmul.f32 %v4249_v23, %v4245_v8  ;;  %4035 = vmatprep.subr.bf16.mxu1 %v4376_v7  ;;  %v4204_v8 = vld [vmem:[%s5034_s8 + $0x10] sm:$0xff]  }
 0xa9d   :  { %4019 = vmatmul.mubr.msk.f32.vlgmr.msra.gmra.mrb[20].mxu0 %vm187_vm2, %v1502_v22 }
 0xa9e   :  { %4031 = vmatprep.mubr.msk.bf16.mxu0 %vm4377_vm1, %v4376_v7  ;;  %4028 = vmatpush3.bf16.msra.mxu0 %v4200_v53 }
 0xa9f   :  { %4029 = vmatprep.subr.bf16.mxu0 %v4376_v7 }
 0xaa2   :  { %4030 = vmatpush3.bf16.msra.mxu0 %v4201_v29 }
 0xaa3   :  { %4047 = vmatprep.subr.bf16.mxu0 %v4376_v7 }
 0xb0c   :  { %v1316_v27 = vpop.f32.mrb[20].mxu1 }
 0xb0d   :  { %v1323_v28 = vadd.f32 %v1316_v27, %v4661_v13  ;;  %v3999_v30 = vpop.f32.mrb[21].mxu1 }
 0xb0e   :  { %v1319_v33 = vpop.f32.mrb[22].mxu1 }
 0xb0f   :  { %v1324_v34 = vadd.f32 %v1319_v33, %v4663_v17  ;;  %v4000_v35 = vpop.f32.mrb[23].mxu1 }
 0xb10   :  { %v4206_v35 = vld [vmem:[%s5029_s3 + $0x10] sm:$0xff]  }
 0xb6c   :  { %v1575_v37 = vpop.f32.mrb[24].mxu1 }
 0xb6d   :  { %v4015_v38 = vpop.f32.mrb[25].mxu1 }
 0xb70   :  { %v1651_v39 = vpop.f32.mrb[20].mxu0 }
 0xb71   :  { %v1655_v40 = vpack.c.bf16 %v1651_v39, %v1575_v37  ;;  %v4020_v41 = vpop.f32.mrb[21].mxu0  ;;  %v4207_v37 = vld [vmem:[%s5029_s3 + $0x18] sm:$0xff]  }
 0xb73   :  { %4024 = vmatmul.mubr.msk.bf16.vlgmr.msra.gmra.mrb[28].mxu1 %vm187_vm2, %v1655_v40 }
 0xb74   :  { %4043 = vmatprep.mubr.msk.bf16.mxu1 %vm4377_vm1, %v4376_v7 }
 0xc46   :  { %v1698_v42 = vpop.f32.mrb[28].mxu1 }
 0xc47   :  { %v1705_v43 = vadd.f32 %v1698_v42, %v1323_v28  ;;  %v4025_v44 = vpop.f32.mrb[29].mxu1 }
 0xc48   :  { %v1701_v45 = vpop.f32.mrb[30].mxu1 }
 0xc49   :  { %v1707_v13 = vadd.f32 %v1705_v43, %v4473_v0  ;;  %v1706_v46 = vadd.f32 %v1701_v45, %v1324_v34  ;;  %v4026_v48 = vpop.f32.mrb[31].mxu1  ;;  %v4202_v0 = vld [vmem:[%s5034_s8] sm:$0xff]  }
 0xc4a   :  { %4036 = vmatpush3.bf16.msra.mxu1 %v4202_v0 }
 0xc4b   :  { %v1708_v17 = vadd.f32 %v1706_v46, %v4475_v1  ;;  %v1710_v49 = vmul.f32 %v1707_v13, %v1707_v13  ;;  %v4203_v1 = vld [vmem:[%s5034_s8 + $0x8] sm:$0xff]   ;;  %4037 = vmatprep.subr.bf16.mxu1 %v4376_v7  ;;  %v3754_v46 = vld [vmem:[%s5031_s5 + $0x1] ss:$0 sm:$0xff] }
 0xc4d   :  { %v1712_v50 = vsel %vm99_vm0, %v1710_v49, 0.0  ;;  %v1711_v25 = vmul.f32 %v1708_v17, %v1708_v17 }
 0xc4e   :  { %1713 = vadd.xlane.f32.xlu0 %v1712_v50  ;;  %4038 = vmatpush3.bf16.msra.mxu1 %v4203_v1 }
 0xc4f   :  { %v1715_v52 = vsel %vm99_vm0, %v1711_v25, 0.0  ;;  %4039 = vmatprep.subr.bf16.mxu1 %v4376_v7 }
 0xc50   :  { %1716 = vadd.xlane.f32.xlu1 %v1715_v52 }
 0xc52   :  { %4040 = vmatpush3.bf16.msra.mxu1 %v4204_v8 }
 0xc53   :  { %4041 = vmatprep.subr.bf16.mxu1 %v4376_v7 }
 0xc56   :  { %4042 = vmatpush3.bf16.msra.mxu1 %v4205_v9 }
 0xc57   :  { %4060 = vmatprep.subr.mxu1 %v4376_v7 }
 0xcdb   :  { %v1714_v54 = vpop.xlane.xlu0 %1713 }
 0xcdc   :  { %v1718_v55 = vmul.f32 0.03125, %v1714_v54 }
 0xcdd   :  { %v1717_v57 = vpop.xlane.xlu1 %1716 }
 0xcde   :  { %v1720_v58 = vadd.f32 1e-06, %v1718_v55  ;;  %v1719_v32 = vmul.f32 0.03125, %v1717_v57 }
 0xce0   :  { %4250 = vrsqrt.f32 %v1720_v58  ;;  %v1721_v59 = vadd.f32 1e-06, %v1719_v32 }
 0xce2   :  { %4252 = vrsqrt.f32 %v1721_v59 }
 0xcea   :  { %v4251_v60 = vpop.eup %4250 }
 0xceb   :  { %v1724_v61 = vmul.f32 %v4251_v60, %v1707_v13 }
 0xcec   :  { %v4253_v62 = vpop.eup %4252 }
 0xced   :  { %v1725_v2 = vmul.f32 %v4253_v62, %v1708_v17  ;;  %v1732_v3 = vmul.f32 %v3744_v63, %v1724_v61 }
 0xcef   :  { %v1733_v4 = vmul.f32 %v3744_v63, %v1725_v2 }
 0xcf1   :  { %v1734_v6 = vpack.c.bf16 %v1733_v4, %v1732_v3 }
 0xcf3   :  { %4032 = vmatmul.mubr.msk.bf16.vlgmr.msra.gmra.mrb[24].mxu0 %vm99_vm0, %v1734_v6 }
 0xcf4   :  { %4051 = vmatprep.mubr.msk.bf16.mxu0 %vm4377_vm1, %v4376_v7  ;;  %4048 = vmatpush3.bf16.msra.mxu0 %v4206_v35 }
 0xcf5   :  { %4049 = vmatprep.subr.bf16.mxu0 %v4376_v7 }
 0xcf8   :  { %4050 = vmatpush3.bf16.msra.mxu0 %v4207_v37 }
 0xcf9   :  { %4055 = vmatprep.subr.mxu0 %v4376_v7 }
 0xdc6   :  { %v1788_v10 = vpop.f32.mrb[24].mxu0 }
 0xdc7   :  { %v4033_v11 = vpop.f32.mrb[25].mxu0  ;;  %v1795_v15 = vmax.f32 %v1788_v10, 0.0 }
 0xdc8   :  { %v1791_v12 = vpop.f32.mrb[26].mxu0 }
 0xdc9   :  { %v1796_v16 = vmax.f32 %v1791_v12, 0.0  ;;  %v4034_v18 = vpop.f32.mrb[27].mxu0 }
 0xdcb   :  { %v1797_v20 = vpack.c.bf16 %v1796_v16, %v1795_v15 }
 0xdcd   :  { %4044 = vmatmul.mubr.msk.bf16.vlgmr.msra.gmra.mrb[32].mxu1 %vm1830_vm4, %v1797_v20 }
 0xdce   :  { %4062 = vmatprep.mubr.msk.f32.mxu1 %vm4377_vm1, %v4376_v7 }
 0xea0   :  { %v1868_v21 = vpop.f32.mrb[32].mxu1 }
 0xea1   :  { %v4766_v23 = vadd.f32 %v1868_v21, %v1707_v13  ;;  %v4045_v22 = vpop.f32.mrb[33].mxu1 }
 0xea2   :  { %v1871_v24 = vpop.f32.mrb[34].mxu1 }
 0xea3   :  { %v4768_v26 = vadd.f32 %v1871_v24, %v1708_v17  ;;  %v4046_v27 = vpop.f32.mrb[35].mxu1  ;;  %v1879_v28 = vmul.f32 %v4766_v23, %v4766_v23 }
 0xea5   :  { %v1881_v30 = vsel %vm99_vm0, %v1879_v28, 0.0  ;;  %v1880_v33 = vmul.f32 %v4768_v26, %v4768_v26 }
 0xea6   :  { %1882 = vadd.xlane.f32.xlu0 %v1881_v30 }
 0xea7   :  { %v1884_v34 = vsel %vm99_vm0, %v1880_v33, 0.0 }
 0xeaa   :  { %1885 = vadd.xlane.f32.xlu0 %v1884_v34 }
 0xf33   :  { %v1883_v38 = vpop.xlane.xlu0 %1882 }
 0xf34   :  { %v1887_v39 = vmul.f32 0.03125, %v1883_v38 }
 0xf36   :  { %v1889_v40 = vadd.f32 1e-06, %v1887_v39 }
 0xf37   :  { %v1886_v41 = vpop.xlane.xlu0 %1885 }
 0xf38   :  { %4254 = vrsqrt.f32 %v1889_v40  ;;  %v1888_v42 = vmul.f32 0.03125, %v1886_v41 }
 0xf3a   :  { %v1890_v43 = vadd.f32 1e-06, %v1888_v42 }
 0xf3c   :  { %4256 = vrsqrt.f32 %v1890_v43 }
 0xf42   :  { %v4255_v44 = vpop.eup %4254 }
 0xf43   :  { %v1893_v45 = vmul.f32 %v4255_v44, %v4766_v23 }
 0xf45   :  { %v1901_v17 = vmul.f32 %v3754_v46, %v1893_v45 }
 0xf46   :  { %v4257_v13 = vpop.eup %4256 }
 0xf47   :  { %v1894_v48 = vmul.f32 %v4257_v13, %v4768_v26 }
 0xf49   :  { %v1902_v49 = vmul.f32 %v3754_v46, %v1894_v48 }
 0xf4b   :  { %v1903_v50 = vpack.c.bf16 %v1902_v49, %v1901_v17 }
 0xf4d   :  { %4052 = vmatmul.mubr.msk.bf16.vlgmr.msra.gmra.mrb[28].mxu0 %vm99_vm0, %v1903_v50 }
 0xf4e   :  { %4057 = vmatprep.mubr.msk.f32.mxu0 %vm4377_vm1, %v4376_v7 }
0x1020   :  { %v4792_v25 = vpop.f32.mrb[28].mxu0 }
0x1021   :  { %1966 = vrot.lane.b32.xlu0 %v4792_v25, %s4378_s27  ;;  %v4053_v52 = vpop.f32.mrb[29].mxu0 }
0x1022   :  { %v4796_v53 = vpop.f32.mrb[30].mxu0 }
0x1023   :  { %2043 = vrot.lane.b32.xlu1 %v4796_v53, %s4378_s27  ;;  %v4054_v29 = vpop.f32.mrb[31].mxu0 }
0x1093   :  { %v1967_v0 = vpop.permute.xlu0 %1966 }
0x1094   :  { %4056 = vmatpush3.xpose.msk.msra.mxu0 %vm187_vm2, %v1967_v0 }
0x1095   :  { %v2044_v1 = vpop.permute.xlu1 %2043  ;;  %4065 = vmatprep.subr.mxu0 %v4376_v7 }
0x1096   :  { %4061 = vmatpush3.xpose.msk.msra.mxu1 %vm187_vm2, %v2044_v1 }
0x1097   :  { %4058 = vmatmul.mubr.msk.f32.vlgmr.msra.gmra.mrb[22].mxu0 %vm187_vm2, %v4792_v25  ;;  %4070 = vmatprep.subr.mxu1 %v4376_v7 }
0x1098   :  { %4067 = vmatprep.mubr.msk.f32.mxu0 %vm4377_vm1, %v4376_v7 }
0x1099   :  { %4063 = vmatmul.mubr.msk.f32.vlgmr.msra.gmra.mrb[26].mxu1 %vm187_vm2, %v4796_v53 }
0x109a   :  { %4072 = vmatprep.mubr.msk.f32.mxu1 %vm4377_vm1, %v4376_v7 }
0x116a   :  { %v2038_v54 = vpop.f32.mrb[22].mxu0 }
0x116b   :  { %v2039_v55 = vadd.f32 %v2038_v54, %v4534_v31  ;;  %v4059_v57 = vpop.f32.mrb[23].mxu0 }
0x116c   :  { %v2115_v58 = vpop.f32.mrb[26].mxu1  ;;  %v3775_v57 = vld [vmem:[%s5030_s4 + $0x14] sm:$0xf] }
0x116d   :  { %v2116_v32 = vadd.f32 %v2115_v58, %v4543_v36  ;;  %v4064_v59 = vpop.f32.mrb[27].mxu1  ;;  %v2119_v60 = vsel %vm187_vm2, %v2039_v55, -inf }
0x116e   :  { %2120 = vmax.xlane.f32.xlu0 %v2119_v60  ;;  %v2633_v59 = vsel %vm851_vm3, %v3775_v57, 0  ;;  %v3768_v60 = vld [vmem:[%s5030_s4 + $0x10] sm:$0xf] }
0x116f   :  { %v2122_v61 = vsel %vm187_vm2, %v2116_v32, -inf }
0x1170   :  { %2123 = vmax.xlane.f32.xlu1 %v2122_v61 }
0x1181   :  { %2217 = vrot.lane.b32.xlu1 %v4796_v53, %s4374_s0 }
0x1184   :  { %2141 = vrot.lane.b32.xlu0 %v4792_v25, %s4374_s0 }
0x1185   :  { %2298 = vrot.lane.b32.xlu1 %v4792_v25, %s4379_s15 }
0x1189   :  { %2376 = vrot.lane.b32.xlu1 %v4796_v53, %s4379_s15 }
0x118d   :  { %2374 = vrot.lane.b32.xlu1 %v4796_v53, %s4380_s1 }
0x11fb   :  { %v2121_v31 = vpop.xlane.xlu0 %2120 }
0x11fc   :  { %v2125_v36 = vsub.f32 %v2039_v55, %v2121_v31 }
0x11fd   :  { %v2124_v62 = vpop.xlane.xlu1 %2123 }
0x11fe   :  { %v2127_v63 = vmul.f32 1.442695, %v2125_v36  ;;  %v2126_v2 = vsub.f32 %v2116_v32, %v2124_v62  ;;  %v2680_v36 = vsel %vm851_vm3, %v3768_v60, 0 }
0x11ff   :  { %v2142_v3 = vpop.permute.xlu0 %2141 }
0x1200   :  { %4258 = vpow2.f32 %v2127_v63  ;;  %v2129_v4 = vmul.f32 1.442695, %v2126_v2  ;;  %4066 = vmatpush3.msra.mxu0 %v2142_v3 }
0x1201   :  { %v2218_v6 = vpop.permute.xlu1 %2217  ;;  %4075 = vmatprep.subr.mxu0 %v4376_v7 }
0x1202   :  { %4260 = vpow2.f32 %v2129_v4  ;;  %4071 = vmatpush3.msra.mxu1 %v2218_v6 }
0x1203   :  { %4080 = vmatprep.subr.mxu1 %v4376_v7 }
0x1205   :  { %v2299_v16 = vpop.permute.xlu1 %2298 }
0x1209   :  { %v2377_v22 = vpop.permute.xlu1 %2376 }
0x120a   :  { %v4259_v8 = vpop.eup %4258 }
0x120b   :  { %v2131_v9 = vsel %vm187_vm2, %v4259_v8, 0.0 }
0x120c   :  { %v4261_v10 = vpop.eup %4260  ;;  %2132 = vadd.xlane.f32.xlu0 %v2131_v9 }
0x120d   :  { %v2134_v11 = vsel %vm187_vm2, %v4261_v10, 0.0  ;;  %v2375_v28 = vpop.permute.xlu1 %2374 }
0x1210   :  { %2135 = vadd.xlane.f32.xlu0 %v2134_v11 }
0x1226   :  { %2296 = vrot.lane.b32.xlu0 %v4792_v25, %s4380_s1 }
0x1299   :  { %v2133_v12 = vpop.xlane.xlu0 %2132 }
0x129a   :  { %4262 = vrcp.f32 %v2133_v12 }
0x129d   :  { %v2136_v15 = vpop.xlane.xlu0 %2135 }
0x129e   :  { %4264 = vrcp.f32 %v2136_v15 }
0x12a1   :  { %v2297_v27 = vpop.permute.xlu0 %2296 }
0x12a4   :  { %v4263_v18 = vpop.eup %4262 }
0x12a5   :  { %v2139_v20 = vmul.f32 %v4263_v18, %v4259_v8 }
0x12a7   :  { %4068 = vmatmul.mubr.msk.f32.vlgmr.msra.gmra.mrb[32].mxu0 %vm187_vm2, %v2139_v20 }
0x12a8   :  { %v4265_v21 = vpop.eup %4264  ;;  %4076 = vmatpush3.xpose.msk.msra.mxu0 %vm187_vm2, %v2299_v16  ;;  %4077 = vmatprep.mubr.msk.f32.mxu0 %vm4377_vm1, %v4376_v7 }
0x12a9   :  { %v2140_v24 = vmul.f32 %v4265_v21, %v4261_v10  ;;  %4085 = vmatprep.subr.mxu0 %v4376_v7 }
0x12ab   :  { %4073 = vmatmul.mubr.msk.f32.vlgmr.msra.gmra.mrb[36].mxu1 %vm187_vm2, %v2140_v24  ;;  %4078 = vmatmul.mubr.msk.f32.vlgmr.msra.gmra.mrb[34].mxu0 %vm187_vm2, %v2297_v27 }
0x12ac   :  { %4081 = vmatpush3.xpose.msk.msra.mxu1 %vm187_vm2, %v2377_v22  ;;  %4082 = vmatprep.mubr.msk.f32.mxu1 %vm4377_vm1, %v4376_v7 }
0x12ad   :  { %4090 = vmatprep.subr.mxu1 %v4376_v7  ;;  %4087 = vmatprep.mubr.msk.f32.mxu0 %vm4377_vm1, %v4376_v7 }
0x12af   :  { %4083 = vmatmul.mubr.msk.f32.vlgmr.msra.gmra.mrb[38].mxu1 %vm187_vm2, %v2375_v28 }
0x12b0   :  { %4092 = vmatprep.mubr.msk.f32.mxu1 %vm4377_vm1, %v4376_v7 }
0x137a   :  { %v4848_v30 = vpop.f32.mrb[32].mxu0 }
0x137b   :  { %v4069_v33 = vpop.f32.mrb[33].mxu0 }
0x137e   :  { %v2289_v34 = vpop.f32.mrb[36].mxu1  ;;  %v2370_v35 = vpop.f32.mrb[34].mxu0 }
0x137f   :  { %v2293_v37 = vpack.c.bf16 %v2289_v34, %v4848_v30  ;;  %v2371_v38 = vadd.f32 %v2370_v35, %v4589_v14  ;;  %v4074_v39 = vpop.f32.mrb[37].mxu1  ;;  %v4079_v40 = vpop.f32.mrb[35].mxu0 }
0x1381   :  { %v2452_v41 = vsel %vm187_vm2, %v2371_v38, -inf }
0x1382   :  { %v2448_v42 = vpop.f32.mrb[38].mxu1  ;;  %2453 = vmax.xlane.f32.xlu0 %v2452_v41 }
0x1383   :  { %v2449_v43 = vadd.f32 %v2448_v42, %v4584_v5  ;;  %v4084_v44 = vpop.f32.mrb[39].mxu1 }
0x1385   :  { %v2455_v45 = vsel %vm187_vm2, %v2449_v43, -inf }
0x1386   :  { %2456 = vmax.xlane.f32.xlu1 %v2455_v45 }
0x1397   :  { %2550 = vrot.lane.b32.xlu1 %v4796_v53, %s4381_s14 }
0x139b   :  { %2803 = vrot.lane.b32.xlu1 %v4796_v53, %s4382_s18 }
0x139f   :  { %2801 = vrot.lane.b32.xlu1 %v4796_v53, %s4383_s19 }
0x13a3   :  { %2723 = vrot.lane.b32.xlu1 %v4792_v25, %s4383_s19 }
0x13a7   :  { %3107 = vrot.lane.b32.xlu1 %v4792_v25, %s4384_s7 }
0x140f   :  { %v2454_v5 = vpop.xlane.xlu0 %2453 }
0x1410   :  { %v2458_v14 = vsub.f32 %v2371_v38, %v2454_v5 }
0x1412   :  { %v2460_v13 = vmul.f32 1.442695, %v2458_v14 }
0x1413   :  { %v2457_v46 = vpop.xlane.xlu1 %2456 }
0x1414   :  { %4266 = vpow2.f32 %v2460_v13  ;;  %v2459_v48 = vsub.f32 %v2449_v43, %v2457_v46 }
0x1416   :  { %v2462_v17 = vmul.f32 1.442695, %v2459_v48 }
0x1417   :  { %v2551_v49 = vpop.permute.xlu1 %2550 }
0x1418   :  { %4268 = vpow2.f32 %v2462_v17  ;;  %4091 = vmatpush3.msra.mxu1 %v2551_v49 }
0x1419   :  { %4101 = vmatprep.subr.bf16.mxu1 %v4376_v7 }
0x141b   :  { %v2804_v62 = vpop.permute.xlu1 %2803 }
0x141e   :  { %v4267_v50 = vpop.eup %4266 }
0x141f   :  { %v2464_v52 = vsel %vm187_vm2, %v4267_v50, 0.0  ;;  %v2802_v63 = vpop.permute.xlu1 %2801 }
0x1420   :  { %2465 = vadd.xlane.f32.xlu0 %v2464_v52 }
0x1422   :  { %v4269_v29 = vpop.eup %4268 }
0x1423   :  { %v2467_v0 = vsel %vm187_vm2, %v4269_v29, 0.0  ;;  %v2724_v16 = vpop.permute.xlu1 %2723 }
0x1424   :  { %2468 = vadd.xlane.f32.xlu0 %v2467_v0 }
0x1427   :  { %v3108_v45 = vpop.permute.xlu1 %3107 }
0x143a   :  { %2474 = vrot.lane.b32.xlu0 %v4792_v25, %s4381_s14 }
0x143e   :  { %2725 = vrot.lane.b32.xlu0 %v4792_v25, %s4382_s18 }
0x14ad   :  { %v2466_v1 = vpop.xlane.xlu0 %2465 }
0x14ae   :  { %4270 = vrcp.f32 %v2466_v1 }
0x14b1   :  { %v2469_v54 = vpop.xlane.xlu0 %2468 }
0x14b2   :  { %4272 = vrcp.f32 %v2469_v54 }
0x14b5   :  { %v2475_v55 = vpop.permute.xlu0 %2474 }
0x14b6   :  { %4086 = vmatpush3.msra.mxu0 %v2475_v55 }
0x14b7   :  { %4095 = vmatprep.subr.bf16.mxu0 %v4376_v7 }
0x14b8   :  { %v4271_v58 = vpop.eup %4270 }
0x14b9   :  { %v2472_v32 = vmul.f32 %v4271_v58, %v4267_v50  ;;  %v2726_v9 = vpop.permute.xlu0 %2725 }
0x14bb   :  { %4088 = vmatmul.mubr.msk.f32.vlgmr.msra.gmra.mrb[36].mxu0 %vm187_vm2, %v2472_v32 }
0x14bc   :  { %v4273_v61 = vpop.eup %4272  ;;  %4096 = vmatpush3.bf16.msra.mxu0 %v2633_v59  ;;  %4097 = vmatprep.mubr.msk.bf16.mxu0 %vm4377_vm1, %v4376_v7 }
0x14bd   :  { %v2473_v31 = vmul.f32 %v4273_v61, %v4269_v29  ;;  %4107 = vmatprep.subr.mxu0 %v4376_v7 }
0x14bf   :  { %4093 = vmatmul.mubr.msk.f32.vlgmr.msra.gmra.mrb[40].mxu1 %vm187_vm2, %v2473_v31 }
0x14c0   :  { %4102 = vmatpush3.bf16.msra.mxu1 %v2680_v36  ;;  %4103 = vmatprep.mubr.msk.bf16.mxu1 %vm4377_vm1, %v4376_v7 }
0x14c1   :  { %4112 = vmatprep.subr.mxu1 %v4376_v7 }
0x14c3   :  { %4104 = vmatmul.mubr.msk.bf16.vlgmr.msra.gmra.mrb[44].mxu1 %vm187_vm2, %v2293_v37 }
0x14c4   :  { %4114 = vmatprep.mubr.msk.f32.mxu1 %vm4377_vm1, %v4376_v7 }
0x14c9   :  { %4113 = vmatpush3.xpose.msk.msra.mxu1 %vm187_vm2, %v2804_v62 }
0x14ca   :  { %4122 = vmatprep.subr.mxu1 %v4376_v7 }
0x14cc   :  { %4115 = vmatmul.mubr.msk.f32.vlgmr.msra.gmra.mrb[42].mxu1 %vm187_vm2, %v2802_v63 }
0x14cd   :  { %4124 = vmatprep.mubr.msk.f32.mxu1 %vm4377_vm1, %v4376_v7 }
0x158e   :  { %v2546_v2 = vpop.f32.mrb[36].mxu0 }
0x158f   :  { %v4089_v3 = vpop.f32.mrb[37].mxu0 }
0x1592   :  { %v2622_v4 = vpop.f32.mrb[40].mxu1 }
0x1593   :  { %v2626_v6 = vpack.c.bf16 %v2622_v4, %v2546_v2  ;;  %v4094_v8 = vpop.f32.mrb[41].mxu1  ;;  %v3784_v2 = vld [vmem:[%s5030_s4 + $0x18] sm:$0xf] }
0x1594   :  { %v3060_v3 = vsel %vm851_vm3, %v3784_v2, 0 }
0x1595   :  { %4098 = vmatmul.mubr.msk.bf16.vlgmr.msra.gmra.mrb[40].mxu0 %vm187_vm2, %v2626_v6 }
0x1596   :  { %4108 = vmatpush3.xpose.msk.msra.mxu0 %vm187_vm2, %v2726_v9  ;;  %v2716_v10 = vpop.f32.mrb[44].mxu1  ;;  %4109 = vmatprep.mubr.msk.f32.mxu0 %vm4377_vm1, %v4376_v7 }
0x1597   :  { %v4105_v11 = vpop.f32.mrb[45].mxu1  ;;  %4117 = vmatprep.subr.mxu0 %v4376_v7 }
0x1598   :  { %v2719_v12 = vpop.f32.mrb[46].mxu1 }
0x1599   :  { %v4106_v15 = vpop.f32.mrb[47].mxu1 }
0x159d   :  { %4110 = vmatmul.mubr.msk.f32.vlgmr.msra.gmra.mrb[38].mxu0 %vm187_vm2, %v2724_v16 }
0x159e   :  { %4119 = vmatprep.mubr.msk.f32.mxu0 %vm4377_vm1, %v4376_v7 }
0x159f   :  { %v2875_v18 = vpop.f32.mrb[42].mxu1 }
0x15a0   :  { %v2876_v20 = vadd.f32 %v2875_v18, %v4639_v56  ;;  %v4116_v21 = vpop.f32.mrb[43].mxu1 }
0x15a2   :  { %v2882_v22 = vsel %vm187_vm2, %v2876_v20, -inf }
0x15a3   :  { %2883 = vmax.xlane.f32.xlu0 %v2882_v22 }
0x15b9   :  { %2977 = vrot.lane.b32.xlu0 %v4796_v53, %s4385_s29 }
0x15bd   :  { %3105 = vrot.lane.b32.xlu0 %v4792_v25, %s4386_s30 }
0x15c1   :  { %3183 = vrot.lane.b32.xlu0 %v4796_v53, %s4386_s30 }
0x1630   :  { %v2884_v24 = vpop.xlane.xlu0 %2883 }
0x1631   :  { %v2886_v27 = vsub.f32 %v2876_v20, %v2884_v24 }
0x1633   :  { %v2889_v28 = vmul.f32 1.442695, %v2886_v27 }
0x1634   :  { %v2978_v30 = vpop.permute.xlu0 %2977 }
0x1635   :  { %4274 = vpow2.f32 %v2889_v28  ;;  %4123 = vmatpush3.msra.mxu1 %v2978_v30 }
0x1636   :  { %4133 = vmatprep.subr.mxu1 %v4376_v7 }
0x1638   :  { %v3106_v46 = vpop.permute.xlu0 %3105 }
0x163c   :  { %v3184_v48 = vpop.permute.xlu0 %3183 }
0x163f   :  { %v4275_v56 = vpop.eup %4274 }
0x1640   :  { %v2894_v33 = vsel %vm187_vm2, %v4275_v56, 0.0 }
0x1641   :  { %2895 = vadd.xlane.f32.xlu1 %v2894_v33 }
0x1652   :  { %3185 = vrot.lane.b32.xlu1 %v4796_v53, %s4384_s7 }
0x1668   :  { %v2669_v34 = vpop.f32.mrb[40].mxu0 }
0x1669   :  { %v4917_v35 = vadd.f32 %v2716_v10, %v2669_v34  ;;  %v4099_v37 = vpop.f32.mrb[41].mxu0 }
0x166a   :  { %v2672_v38 = vpop.f32.mrb[42].mxu0 }
0x166b   :  { %v4919_v39 = vadd.f32 %v2719_v12, %v2672_v38  ;;  %v4100_v40 = vpop.f32.mrb[43].mxu0 }
0x1670   :  { %v2797_v41 = vpop.f32.mrb[38].mxu0 }
0x1671   :  { %v2798_v42 = vadd.f32 %v2797_v41, %v4666_v19  ;;  %v4111_v43 = vpop.f32.mrb[39].mxu0 }
0x1673   :  { %v2879_v44 = vsel %vm187_vm2, %v2798_v42, -inf }
0x1676   :  { %2880 = vmax.xlane.f32.xlu1 %v2879_v44 }
0x16ce   :  { %v2896_v5 = vpop.xlane.xlu1 %2895 }
0x16cf   :  { %4276 = vrcp.f32 %v2896_v5 }
0x16d2   :  { %v3186_v19 = vpop.permute.xlu1 %3185 }
0x16d9   :  { %v4277_v14 = vpop.eup %4276 }
0x16da   :  { %v2900_v13 = vmul.f32 %v4277_v14, %v4275_v56  ;;  %v3792_v56 = vld [vmem:[%s5030_s4 + $0x1c] sm:$0xf] }
0x16db   :  { %v3442_v33 = vsel %vm851_vm3, %v3792_v56, 0 }
0x16dc   :  { %4125 = vmatmul.mubr.msk.f32.vlgmr.msra.gmra.mrb[48].mxu1 %vm187_vm2, %v2900_v13 }
0x16dd   :  { %4134 = vmatpush3.xpose.msk.msra.mxu1 %vm187_vm2, %v3108_v45  ;;  %4135 = vmatprep.mubr.msk.f32.mxu1 %vm4377_vm1, %v4376_v7 }
0x16de   :  { %4138 = vmatprep.subr.mxu1 %v4376_v7 }
0x16e0   :  { %4136 = vmatmul.mubr.msk.f32.vlgmr.msra.gmra.mrb[50].mxu1 %vm187_vm2, %v3106_v46 }
0x16e1   :  { %4139 = vmatpush3.xpose.msk.msra.mxu1 %vm187_vm2, %v3186_v19  ;;  %4140 = vmatprep.mubr.msk.f32.mxu1 %vm4377_vm1, %v4376_v7 }
0x16e2   :  { %4148 = vmatprep.subr.mxu1 %v4376_v7 }
0x16e4   :  { %4141 = vmatmul.mubr.msk.f32.vlgmr.msra.gmra.mrb[52].mxu1 %vm187_vm2, %v3184_v48 }
0x16e5   :  { %4150 = vmatprep.mubr.msk.f32.mxu1 %vm4377_vm1, %v4376_v7 }
0x1703   :  { %v2881_v17 = vpop.xlane.xlu1 %2880 }
0x1704   :  { %v2885_v49 = vsub.f32 %v2798_v42, %v2881_v17 }
0x1706   :  { %v2887_v50 = vmul.f32 1.442695, %v2885_v49 }
0x1708   :  { %4278 = vpow2.f32 %v2887_v50 }
0x1712   :  { %v4279_v52 = vpop.eup %4278 }
0x1713   :  { %v2891_v29 = vsel %vm187_vm2, %v4279_v52, 0.0 }
0x1714   :  { %2892 = vadd.xlane.f32.xlu0 %v2891_v29 }
0x172a   :  { %2901 = vrot.lane.b32.xlu0 %v4792_v25, %s4385_s29 }
0x172e   :  { %3359 = vrot.lane.b32.xlu0 %v4796_v53, %s4387_s11 }
0x17a1   :  { %v2893_v0 = vpop.xlane.xlu0 %2892 }
0x17a2   :  { %4280 = vrcp.f32 %v2893_v0 }
0x17a5   :  { %v2902_v1 = vpop.permute.xlu0 %2901 }
0x17a6   :  { %4118 = vmatpush3.msra.mxu0 %v2902_v1  ;;  %v4208_v1 = vld [vmem:[#allocation5 + $0x10] sm:$0xff]  }
0x17a7   :  { %4127 = vmatprep.subr.bf16.mxu0 %v4376_v7 }
0x17a9   :  { %v3360_v54 = vpop.permute.xlu0 %3359 }
0x17aa   :  { %4149 = vmatpush3.msra.mxu1 %v3360_v54  ;;  %v4209_v54 = vld [vmem:[#allocation5 + $0x18] sm:$0xff]  }
0x17ab   :  { %4159 = vmatprep.subr.bf16.mxu1 %v4376_v7 }
0x17ac   :  { %v4281_v55 = vpop.eup %4280 }
0x17ad   :  { %v2899_v57 = vmul.f32 %v4281_v55, %v4279_v52 }
0x17af   :  { %4120 = vmatmul.mubr.msk.f32.vlgmr.msra.gmra.mrb[44].mxu0 %vm187_vm2, %v2899_v57  ;;  %v3049_v58 = vpop.f32.mrb[48].mxu1 }
0x17b0   :  { %v4126_v32 = vpop.f32.mrb[49].mxu1  ;;  %4129 = vmatprep.mubr.msk.bf16.mxu0 %vm4377_vm1, %v4376_v7  ;;  %4128 = vmatpush3.bf16.msra.mxu0 %v3060_v3 }
0x17b1   :  { %4143 = vmatprep.subr.mxu0 %v4376_v7 }
0x17b3   :  { %v3179_v53 = vpop.f32.mrb[50].mxu1 }
0x17b4   :  { %v3180_v59 = vadd.f32 %v3179_v53, %v4692_v47  ;;  %v4137_v60 = vpop.f32.mrb[51].mxu1 }
0x17b6   :  { %v3261_v61 = vsel %vm187_vm2, %v3180_v59, -inf }
0x17b7   :  { %v3257_v31 = vpop.f32.mrb[52].mxu1  ;;  %3262 = vmax.xlane.f32.xlu1 %v3261_v61 }
0x17b8   :  { %v3258_v36 = vadd.f32 %v3257_v31, %v4697_v51  ;;  %v4142_v62 = vpop.f32.mrb[53].mxu1 }
0x17ba   :  { %v3264_v63 = vsel %vm187_vm2, %v3258_v36, -inf }
0x17bb   :  { %3265 = vmax.xlane.f32.xlu1 %v3264_v63 }
0x1844   :  { %v3263_v47 = vpop.xlane.xlu1 %3262 }
0x1845   :  { %v3267_v4 = vsub.f32 %v3180_v59, %v3263_v47  ;;  %v4212_v47 = vld [vmem:[%s5034_s8 + $0x30] sm:$0xff]  }
0x1847   :  { %v3269_v6 = vmul.f32 1.442695, %v3267_v4  ;;  %v4213_v4 = vld [vmem:[%s5034_s8 + $0x38] sm:$0xff]  }
0x1848   :  { %v3266_v8 = vpop.xlane.xlu1 %3265 }
0x1849   :  { %4282 = vpow2.f32 %v3269_v6  ;;  %v3268_v9 = vsub.f32 %v3258_v36, %v3266_v8  ;;  %v3795_v36 = vld [vmem:[%s5032_s6 + $0x1] ss:$0 sm:$0xff] }
0x184b   :  { %v3271_v51 = vmul.f32 1.442695, %v3268_v9 }
0x184d   :  { %4284 = vpow2.f32 %v3271_v51 }
0x1853   :  { %v4283_v10 = vpop.eup %4282 }
0x1854   :  { %v3273_v11 = vsel %vm187_vm2, %v4283_v10, 0.0 }
0x1855   :  { %3274 = vadd.xlane.f32.xlu1 %v3273_v11 }
0x1857   :  { %v4285_v12 = vpop.eup %4284 }
0x1858   :  { %v3276_v15 = vsel %vm187_vm2, %v4285_v12, 0.0 }
0x1859   :  { %3277 = vadd.xlane.f32.xlu1 %v3276_v15 }
0x186a   :  { %3283 = vrot.lane.b32.xlu1 %v4792_v25, %s4387_s11 }
0x1882   :  { %v2973_v16 = vpop.f32.mrb[44].mxu0 }
0x1883   :  { %v3053_v18 = vpack.c.bf16 %v3049_v58, %v2973_v16  ;;  %v4121_v20 = vpop.f32.mrb[45].mxu0 }
0x1885   :  { %4130 = vmatmul.mubr.msk.bf16.vlgmr.msra.gmra.mrb[48].mxu0 %vm187_vm2, %v3053_v18 }
0x1886   :  { %4145 = vmatprep.mubr.msk.f32.mxu0 %vm4377_vm1, %v4376_v7 }
0x18e2   :  { %v3275_v21 = vpop.xlane.xlu1 %3274 }
0x18e3   :  { %4286 = vrcp.f32 %v3275_v21 }
0x18e6   :  { %v3278_v22 = vpop.xlane.xlu1 %3277 }
0x18e7   :  { %4288 = vrcp.f32 %v3278_v22 }
0x18ea   :  { %v3284_v24 = vpop.permute.xlu1 %3283 }
0x18eb   :  { %4144 = vmatpush3.msra.mxu0 %v3284_v24 }
0x18ec   :  { %4153 = vmatprep.subr.bf16.mxu0 %v4376_v7 }
0x18ed   :  { %v4287_v27 = vpop.eup %4286 }
0x18ee   :  { %v3281_v28 = vmul.f32 %v4287_v27, %v4283_v10 }
0x18f0   :  { %4146 = vmatmul.mubr.msk.f32.vlgmr.msra.gmra.mrb[46].mxu0 %vm187_vm2, %v3281_v28 }
0x18f1   :  { %v4289_v25 = vpop.eup %4288  ;;  %4155 = vmatprep.mubr.msk.bf16.mxu0 %vm4377_vm1, %v4376_v7  ;;  %4154 = vmatpush3.bf16.msra.mxu0 %v3442_v33 }
0x18f2   :  { %v3282_v30 = vmul.f32 %v4289_v25, %v4285_v12  ;;  %4167 = vmatprep.subr.bf16.mxu0 %v4376_v7 }
0x18f4   :  { %4151 = vmatmul.mubr.msk.f32.vlgmr.msra.gmra.mrb[54].mxu1 %vm187_vm2, %v3282_v30 }
0x18f5   :  { %4163 = vmatprep.mubr.msk.bf16.mxu1 %vm4377_vm1, %v4376_v7  ;;  %4160 = vmatpush3.bf16.msra.mxu1 %v4208_v1 }
0x18f6   :  { %4161 = vmatprep.subr.bf16.mxu1 %v4376_v7 }
0x18f9   :  { %4162 = vmatpush3.bf16.msra.mxu1 %v4209_v54 }
0x1958   :  { %v3096_v34 = vpop.f32.mrb[48].mxu0 }
0x1959   :  { %v3103_v37 = vadd.f32 %v3096_v34, %v4917_v35  ;;  %v4131_v38 = vpop.f32.mrb[49].mxu0 }
0x195a   :  { %v3099_v40 = vpop.f32.mrb[50].mxu0 }
0x195b   :  { %v3104_v41 = vadd.f32 %v3099_v40, %v4919_v39  ;;  %v4132_v42 = vpop.f32.mrb[51].mxu0  ;;  %v3812_v40 = vld [vmem:[%s5035_s9] ss:$0 sm:$0xff] }
0x19c3   :  { %v3355_v43 = vpop.f32.mrb[46].mxu0 }
0x19c4   :  { %v4147_v44 = vpop.f32.mrb[47].mxu0 }
0x19c7   :  { %v3431_v45 = vpop.f32.mrb[54].mxu1 }
0x19c8   :  { %v3435_v5 = vpack.c.bf16 %v3431_v45, %v3355_v43  ;;  %v4152_v14 = vpop.f32.mrb[55].mxu1 }
0x19ca   :  { %4156 = vmatmul.mubr.msk.bf16.vlgmr.msra.gmra.mrb[52].mxu0 %vm187_vm2, %v3435_v5 }
0x19cb   :  { %4175 = vmatprep.mubr.msk.bf16.mxu0 %vm4377_vm1, %v4376_v7 }
0x1a9d   :  { %v3478_v13 = vpop.f32.mrb[52].mxu0 }
0x1a9e   :  { %v3485_v46 = vadd.f32 %v3478_v13, %v3103_v37  ;;  %v4157_v19 = vpop.f32.mrb[53].mxu0 }
0x1a9f   :  { %v3481_v48 = vpop.f32.mrb[54].mxu0 }
0x1aa0   :  { %v3487_v35 = vadd.f32 %v3485_v46, %v4766_v23  ;;  %v3486_v17 = vadd.f32 %v3481_v48, %v3104_v41  ;;  %v4158_v49 = vpop.f32.mrb[55].mxu0  ;;  %v4210_v23 = vld [vmem:[%s5034_s8 + $0x20] sm:$0xff]  }
0x1aa1   :  { %4168 = vmatpush3.bf16.msra.mxu0 %v4210_v23 }
0x1aa2   :  { %v3488_v39 = vadd.f32 %v3486_v17, %v4768_v26  ;;  %v3491_v50 = vmul.f32 %v3487_v35, %v3487_v35  ;;  %v4211_v26 = vld [vmem:[%s5034_s8 + $0x28] sm:$0xff]   ;;  %4169 = vmatprep.subr.bf16.mxu0 %v4376_v7 }
0x1aa4   :  { %v3493_v52 = vsel %vm99_vm0, %v3491_v50, 0.0  ;;  %v3492_v29 = vmul.f32 %v3488_v39, %v3488_v39 }
0x1aa5   :  { %3494 = vadd.xlane.f32.xlu0 %v3493_v52  ;;  %4170 = vmatpush3.bf16.msra.mxu0 %v4211_v26 }
0x1aa6   :  { %v3496_v0 = vsel %vm99_vm0, %v3492_v29, 0.0  ;;  %4171 = vmatprep.subr.bf16.mxu0 %v4376_v7 }
0x1aa7   :  { %3497 = vadd.xlane.f32.xlu1 %v3496_v0 }
0x1aa9   :  { %4172 = vmatpush3.bf16.msra.mxu0 %v4212_v47 }
0x1aaa   :  { %4173 = vmatprep.subr.bf16.mxu0 %v4376_v7 }
0x1aad   :  { %4174 = vmatpush3.bf16.msra.mxu0 %v4213_v4 }
0x1b32   :  { %v3495_v55 = vpop.xlane.xlu0 %3494 }
0x1b33   :  { %v3499_v57 = vmul.f32 0.03125, %v3495_v55 }
0x1b34   :  { %v3498_v58 = vpop.xlane.xlu1 %3497 }
0x1b35   :  { %v3501_v32 = vadd.f32 1e-06, %v3499_v57  ;;  %v3500_v53 = vmul.f32 0.03125, %v3498_v58 }
0x1b37   :  { %4290 = vrsqrt.f32 %v3501_v32  ;;  %v3502_v59 = vadd.f32 1e-06, %v3500_v53 }
0x1b39   :  { %4292 = vrsqrt.f32 %v3502_v59 }
0x1b41   :  { %v4291_v60 = vpop.eup %4290 }
0x1b42   :  { %v3505_v61 = vmul.f32 %v4291_v60, %v3487_v35 }
0x1b43   :  { %v4293_v31 = vpop.eup %4292 }
0x1b44   :  { %v3506_v62 = vmul.f32 %v4293_v31, %v3488_v39  ;;  %v3513_v2 = vmul.f32 %v3795_v36, %v3505_v61 }
0x1b46   :  { %v3514_v63 = vmul.f32 %v3795_v36, %v3506_v62 }
0x1b48   :  { %v3515_v3 = vpack.c.bf16 %v3514_v63, %v3513_v2 }
0x1b4a   :  { %4164 = vmatmul.mubr.msk.bf16.vlgmr.msra.gmra.mrb[56].mxu1 %vm99_vm0, %v3515_v3 }
0x1c1d   :  { %v3570_v6 = vpop.f32.mrb[56].mxu1 }
0x1c1e   :  { %v4165_v8 = vpop.f32.mrb[57].mxu1  ;;  %v3577_v51 = vmax.f32 %v3570_v6, 0.0 }
0x1c1f   :  { %v3573_v9 = vpop.f32.mrb[58].mxu1 }
0x1c20   :  { %v3578_v10 = vmax.f32 %v3573_v9, 0.0  ;;  %v4166_v11 = vpop.f32.mrb[59].mxu1 }
0x1c22   :  { %v3579_v12 = vpack.c.bf16 %v3578_v10, %v3577_v51 }
0x1c24   :  { %4176 = vmatmul.mubr.msk.bf16.vlgmr.msra.gmra.mrb[56].mxu0 %vm1830_vm4, %v3579_v12 }
0x1cf7   :  { %v3650_v15 = vpop.f32.mrb[56].mxu0 }
0x1cf8   :  { %v3657_v16 = vadd.f32 %v3650_v15, %v3487_v35  ;;  %v4177_v18 = vpop.f32.mrb[57].mxu0 }
0x1cf9   :  { %v3653_v20 = vpop.f32.mrb[58].mxu0 }
0x1cfa   :  { %v3658_v21 = vadd.f32 %v3653_v20, %v3488_v39  ;;  %v4178_v7 = vpop.f32.mrb[59].mxu0  ;;  %v3660_v22 = vmul.f32 %v3657_v16, %v3657_v16 }
0x1cfc   :  { %v3662_v24 = vsel %vm99_vm0, %v3660_v22, 0.0  ;;  %v3661_v27 = vmul.f32 %v3658_v21, %v3658_v21 }
0x1cfd   :  { %3663 = vadd.xlane.f32.xlu0 %v3662_v24 }
0x1cfe   :  { %v3665_v28 = vsel %vm99_vm0, %v3661_v27, 0.0 }
0x1d01   :  { %3666 = vadd.xlane.f32.xlu0 %v3665_v28 }
0x1d8a   :  { %v3664_v25 = vpop.xlane.xlu0 %3663 }
0x1d8b   :  { %v3668_v30 = vmul.f32 0.03125, %v3664_v25 }
0x1d8d   :  { %v3670_v56 = vadd.f32 1e-06, %v3668_v30 }
0x1d8e   :  { %v3667_v33 = vpop.xlane.xlu0 %3666 }
0x1d8f   :  { %4294 = vrsqrt.f32 %v3670_v56  ;;  %v3669_v34 = vmul.f32 0.03125, %v3667_v33 }
0x1d91   :  { %v3671_v37 = vadd.f32 1e-06, %v3669_v34 }
0x1d93   :  { %4296 = vrsqrt.f32 %v3671_v37 }
0x1d99   :  { %v4295_v38 = vpop.eup %4294 }
0x1d9a   :  { %v3674_v41 = vmul.f32 %v4295_v38, %v3657_v16 }
0x1d9c   :  { %v3682_v42 = vmul.f32 %v3812_v40, %v3674_v41 }
0x1d9d   :  { %v4297_v43 = vpop.eup %4296 }
0x1d9e   :  { %v3675_v44 = vmul.f32 %v4297_v43, %v3658_v21  ;;  %3684 = vst.msk [vmem:[#allocation7] sm:$0xff] %vm99_vm0, %v3682_v42 }
0x1da0   :  { %v3683_v45 = vmul.f32 %v3812_v40, %v3675_v44 }
0x1da2   :  { %3685 = vst.msk [vmem:[#allocation7 + $0x8] sm:$0xff] %vm99_vm0, %v3683_v45 }
0x1da3   :  { %4353 = shalt.err (!%p4350_p6)
}
0x1da4   :  { %s4354_s25 = scalar_lea.hbm %s5036_s10, 256 }
0x1da5   :  { %p4355_p7 = scmp.ne.s32.totalorder %s5036_s10, %s4354_s25  ;;  %p4358_p8 = scmp.lt.u32.totalorder %s4354_s25, %s5036_s10 }
0x1da7   :  { %p4360_p9 = pnand %p4358_p8, %p4355_p7 }
0x1da9   :  { %4363 = shalt.err (!%p4360_p9)
}
0x1daa   :  { %3697 = dma.vmem_to_hbm [thread:$0]  %s3692_s20, 256, %s5036_s10, [#allocation4], %s4371_s23, %s4371_s23, %s4372_s24  }
0x1dab   :  { %4368 = dma.done.wait [#allocation4], 256  }
0x1dac   :  { %4369 = vsyncadd [#allocation4], 4294967040 }
0x1dad   :  { %3701 = vsyncpa [#allocation3], 1 }
0x1dae   :  { %3702 = vsyncpa [#allocation6], 1 }
0x1daf   :  { %3703 = vsyncpa [#allocation4], 1 }

</bundles_post_ra>
